<compile_context>
chip_gen: v6e
topology: v6e:2x2x1
jax: 0.10.0
libtpu: 0.0.40
codegen_flags: <defaults>
</compile_context>

<pallas_src>
import functools
import numpy as np
import jax
import jax.numpy as jnp
from jax import lax
from jax.experimental import pallas as pl
from jax.experimental.pallas import tpu as pltpu

L_TIME = 118     # LayerNorm(118): time-axis length fixed by the module
L_PAD = 128      # lane-dense padded time axis (one 128-lane sub-block per sample)


# ----------------------------------------------------------------------------
# Fused TemporalBlock kernel: one grid step == TB batch samples (lane-folded).
# ----------------------------------------------------------------------------
def _temporal_block_kernel(x_ref, w_ref, bias_ref, ln_ref, *rest, ksize, dilation,
                           tb, L, slope, has_downsample):
    if has_downsample:
        wd_ref, o_ref = rest
    else:
        (o_ref,) = rest

    x = x_ref[...]                                   # (c_in, tb*128), pad lanes zero

    # Causal dilated conv: K accumulating MXU dots on XLU-rolled taps.
    # Tap k is x shifted right by (K-1-k)*dilation; pltpu.roll's circular wrap
    # lands in the zero pad lanes of the neighbouring sample, so it reproduces
    # the causal left pad exactly while (K-1)*dilation <= L_PAD - L (= 10).
    acc = jnp.dot(w_ref[ksize - 1], x, preferred_element_type=jnp.float32)
    for k in range(ksize - 1):
        shift = (ksize - 1 - k) * dilation
        acc = acc + jnp.dot(w_ref[k], pltpu.roll(x, shift=shift, axis=1),
                            preferred_element_type=jnp.float32)
    acc = acc + bias_ref[0]                          # conv bias (c_out, 1)
    acc = jnp.where(acc > 0, acc, slope * acc)       # LeakyReLU (slope = 0.01)

    # Residual path: 1x1 conv only when c_in != c_out, identity otherwise.
    if has_downsample:
        res = jnp.dot(wd_ref[...], x, preferred_element_type=jnp.float32) + bias_ref[1]
    else:
        res = x

    gamma = ln_ref[0:1, :]                           # (1, 128), pad lanes 0
    beta = ln_ref[1:2, :]
    mask = ln_ref[2:3, :]                            # 1.0 on the 118 valid lanes
    inv_n = jnp.float32(1.0 / L)

    # Per-sample LayerNorm over time: each 128-lane sub-block is one sample.
    # Static lane-aligned slices (multiples of 128) -> no relayout.
    for t in range(tb):
        sub = slice(t * L_PAD, (t + 1) * L_PAD)
        a = acc[:, sub]
        mu = jnp.sum(a * mask, axis=-1, keepdims=True) * inv_n
        dev = (a - mu) * mask
        var = jnp.sum(dev * dev, axis=-1, keepdims=True) * inv_n
        ln = dev * lax.rsqrt(var + jnp.float32(1e-5)) * gamma + beta
        # Final ReLU; pad lanes zeroed so chained blocks can consume this layout.
        o_ref[:, sub] = jnp.maximum(ln + res[:, sub], 0.0) * mask


def temporal_block_lane(x_lane, params, *, batch, ksize, dilation, tb=2):
    """Core fused block in the chainable lane-dense layout.

    x_lane: (C_in, batch*128) f32, channel-major; each sample owns one 128-lane
    sub-block with lanes 118..127 zero. Returns (C_out, batch*128) in the same
    layout (pad lanes zeroed), so stacked TCN blocks can be chained without
    re-padding / unaligned slicing in HBM between blocks.
    """
    c_in = x_lane.shape[0]
    c_out = params["w3"].shape[1]
    has_downsample = params["wd"] is not None
    assert batch % tb == 0, "batch must be a multiple of tb"
    if (ksize - 1) * dilation > L_PAD - L_TIME:
        # TODO(synk): for deeper dilation ((K-1)*d > 10) mask the wrapped lanes
        # or fall back to wrapper-side tap stacking.
        raise NotImplementedError("(ksize-1)*dilation must be <= 10 for the roll path")

    kern = functools.partial(_temporal_block_kernel, ksize=ksize, dilation=dilation,
                             tb=tb, L=L_TIME, slope=0.01,
                             has_downsample=has_downsample)

    in_specs = [
        pl.BlockSpec((c_in, tb * L_PAD), lambda b: (0, b)),
        pl.BlockSpec((ksize, c_out, c_in), lambda b: (0, 0, 0)),
        pl.BlockSpec((2, c_out, 1), lambda b: (0, 0, 0)),
        pl.BlockSpec((3, L_PAD), lambda b: (0, 0)),
    ]
    args = [x_lane, params["w3"], params["bias2"], params["ln_pack"]]
    if has_downsample:
        in_specs.append(pl.BlockSpec((c_out, c_in), lambda b: (0, 0)))
        args.append(params["wd"])

    return pl.pallas_call(
        kern,
        out_shape=jax.ShapeDtypeStruct((c_out, batch * L_PAD), jnp.float32),
        grid=(batch // tb,),
        in_specs=in_specs,
        out_specs=pl.BlockSpec((c_out, tb * L_PAD), lambda b: (0, b)),
        compiler_params=pltpu.CompilerParams(
            dimension_semantics=("parallel",),
            vmem_limit_bytes=32 * 1024 * 1024),
    )(*args)


def temporal_block(x, params, *, ksize, dilation, tb=2):
    """[B, C_in, 118] -> [B, C_out, 118]. Layout conversion is done ONCE here;
    a multi-block TCN should chain temporal_block_lane directly instead."""
    B, c_in, L = x.shape
    assert L == L_TIME
    xp = jnp.pad(x.astype(jnp.float32), ((0, 0), (0, 0), (0, L_PAD - L)))
    x_lane = jnp.transpose(xp, (1, 0, 2)).reshape(c_in, B * L_PAD)
    out_lane = temporal_block_lane(x_lane, params, batch=B, ksize=ksize,
                                   dilation=dilation, tb=tb)
    c_out = out_lane.shape[0]
    return jnp.transpose(out_lane.reshape(c_out, B, L_PAD), (1, 0, 2))[:, :, :L]


# ----------------------------------------------------------------------------
# Pure-JAX reference (mirrors the PyTorch module exactly).
# ----------------------------------------------------------------------------
def temporal_block_ref(x, params, *, ksize, dilation):
    B, c_in, L = x.shape
    pad = (ksize - 1) * dilation
    w, b = params["w"], params["b"]                  # w: (c_out, c_in, K)
    c_out = w.shape[0]
    xpl = jnp.pad(x, ((0, 0), (0, 0), (pad, 0)))
    conv = jnp.broadcast_to(b[None, :, :], (B, c_out, L)).astype(jnp.float32)
    for k in range(ksize):
        conv = conv + jnp.einsum('oi,bit->bot', w[:, :, k],
                                 xpl[:, :, k * dilation: k * dilation + L],
                                 precision=lax.Precision.HIGHEST)
    act = jnp.where(conv > 0, conv, 0.01 * conv)     # LeakyReLU
    mu = jnp.mean(act, axis=-1, keepdims=True)
    var = jnp.mean((act - mu) ** 2, axis=-1, keepdims=True)
    ln = (act - mu) / jnp.sqrt(var + 1e-5)
    ln = ln * params["ln_g"][None, None, :] + params["ln_b"][None, None, :]
    if params["wd"] is not None:
        res = jnp.einsum('oi,bit->bot', params["wd"], x,
                         precision=lax.Precision.HIGHEST) + params["bd"][None, :, :]
    else:
        res = x
    return jnp.maximum(ln + res, 0.0)


# ----------------------------------------------------------------------------
# Deterministic synthetic parameters (weight_norm folded into the conv weight;
# kernel-layout copies built once here, not inside the jitted forward).
# ----------------------------------------------------------------------------
def init_params(key, c_in, c_out, ksize):
    kv, kg, kb, kd, kdb, kg2, kb2 = jax.random.split(key, 7)
    fan_in, fan_out = c_in * ksize, c_out * ksize
    std = float(np.sqrt(2.0 / (fan_in + fan_out)))   # xavier_normal_
    v = jax.random.normal(kv, (c_out, c_in, ksize), jnp.float32) * std
    norm = jnp.sqrt(jnp.sum(v * v, axis=(1, 2), keepdims=True))
    g = norm * (1.0 + 0.05 * jax.random.normal(kg, (c_out, 1, 1), jnp.float32))
    w = g * v / norm                                 # weight_norm: w = g * v / ||v||

    b = jax.random.normal(kb, (c_out, 1), jnp.float32) * 0.05
    ln_g = 1.0 + 0.1 * jax.random.normal(kg2, (L_TIME,), jnp.float32)
    ln_b = 0.1 * jax.random.normal(kb2, (L_TIME,), jnp.float32)

    has_downsample = (c_in != c_out)
    if has_downsample:
        wd = jax.random.normal(kd, (c_out, c_in), jnp.float32) / np.sqrt(c_in)
        bd = jax.random.normal(kdb, (c_out, 1), jnp.float32) * 0.05
    else:
        wd = None                                    # identity residual
        bd = jnp.zeros((c_out, 1), jnp.float32)

    pad = L_PAD - L_TIME
    mask = jnp.concatenate([jnp.ones((1, L_TIME), jnp.float32),
                            jnp.zeros((1, pad), jnp.float32)], axis=1)
    ln_pack = jnp.concatenate(
        [jnp.pad(ln_g.reshape(1, L_TIME), ((0, 0), (0, pad))),
         jnp.pad(ln_b.reshape(1, L_TIME), ((0, 0), (0, pad))),
         mask], axis=0)                              # (3, 128): gamma / beta / mask

    return {
        # reference (PyTorch) layouts
        "w": w, "b": b, "wd": wd, "bd": bd, "ln_g": ln_g, "ln_b": ln_b,
        # kernel-ready layouts
        "w3": jnp.transpose(w, (2, 0, 1)),           # (K, c_out, c_in)
        "bias2": jnp.stack([b, bd], axis=0),         # (2, c_out, 1): conv bias, bd
        "ln_pack": ln_pack,                          # (3, 128)
    }


# ----------------------------------------------------------------------------
# Main
# ----------------------------------------------------------------------------
if __name__ == "__main__":
    key = jax.random.PRNGKey(0)

    configs = [
        # (B, C_in, C_out, K, dilation): downsample residual, grid=(4,), N=256/step
        dict(B=8, c_in=96, c_out=128, k=3, d=1),
        # identity residual + deeper dilation (pad = 8 <= 10, roll path still exact)
        dict(B=8, c_in=64, c_out=64, k=3, d=4),
    ]

    for i, cfg in enumerate(configs):
        kx, kp = jax.random.split(jax.random.fold_in(key, i))
        x = jax.random.normal(kx, (cfg["B"], cfg["c_in"], L_TIME), jnp.float32)
        params = init_params(kp, cfg["c_in"], cfg["c_out"], cfg["k"])

        fwd = jax.jit(functools.partial(temporal_block, ksize=cfg["k"],
                                        dilation=cfg["d"], tb=2))
        out = fwd(x, params)
        jax.block_until_ready(out)

        assert out.shape == (cfg["B"], cfg["c_out"], L_TIME), out.shape
        ref = temporal_block_ref(x, params, ksize=cfg["k"], dilation=cfg["d"])
        np.testing.assert_allclose(np.asarray(out), np.asarray(ref),
                                   rtol=3e-3, atol=3e-3)

    print("KERNEL_OK")
</pallas_src>

<mosaic_0001>
module attributes {stable_mosaic.version = 11 : i64} {
  func.func @_temporal_block_kernel(%arg0: i32, %arg1: memref<96x256xf32, #tpu.memory_space<vmem>>, %arg2: memref<3x128x96xf32, #tpu.memory_space<vmem>>, %arg3: memref<2x128x1xf32, #tpu.memory_space<vmem>>, %arg4: memref<3x128xf32, #tpu.memory_space<vmem>>, %arg5: memref<128x96xf32, #tpu.memory_space<vmem>>, %arg6: memref<128x256xf32, #tpu.memory_space<vmem>>) attributes {dimension_semantics = [#tpu.dimension_semantics<parallel>], iteration_bounds = array<i64: 4>, scalar_prefetch = 0 : i64, scratch_operands = 0 : i64, tpu.core_type = #tpu.core_type<tc>, window_params = [{transform_indices = @transform_0, window_bounds = array<i64: 96, 256>}, {pipeline_mode = #tpu.pipeline_mode<synchronous>, transform_indices = @transform_1, window_bounds = array<i64: 3, 128, 96>}, {pipeline_mode = #tpu.pipeline_mode<synchronous>, transform_indices = @transform_2, window_bounds = array<i64: 2, 128, 1>}, {pipeline_mode = #tpu.pipeline_mode<synchronous>, transform_indices = @transform_3, window_bounds = array<i64: 3, 128>}, {pipeline_mode = #tpu.pipeline_mode<synchronous>, transform_indices = @transform_4, window_bounds = array<i64: 128, 96>}, {transform_indices = @transform_5, window_bounds = array<i64: 128, 256>}]} {
    %c0 = arith.constant 0 : index
    %c0_0 = arith.constant 0 : index
    %0 = vector.load %arg1[%c0, %c0_0] : memref<96x256xf32, #tpu.memory_space<vmem>>, vector<96x256xf32>
    %c2 = arith.constant 2 : index
    %c0_1 = arith.constant 0 : index
    %c0_2 = arith.constant 0 : index
    %1 = vector.load %arg2[%c2, %c0_1, %c0_2] : memref<3x128x96xf32, #tpu.memory_space<vmem>>, vector<1x128x96xf32>
    %2 = vector.shape_cast %1 : vector<1x128x96xf32> to vector<128x96xf32>
    %cst = arith.constant dense<0.000000e+00> : vector<128x256xf32>
    %3 = tpu.matmul %2, %0, %cst {dimension_numbers = #tpu.dot_dimension_numbers<[1], [0], [0], [1], [0, 0, 1, 1], [], []>} : vector<128x96xf32>, vector<96x256xf32>, vector<128x256xf32> -> vector<128x256xf32>
    %c0_3 = arith.constant 0 : index
    %c0_4 = arith.constant 0 : index
    %c0_5 = arith.constant 0 : index
    %4 = vector.load %arg2[%c0_3, %c0_4, %c0_5] : memref<3x128x96xf32, #tpu.memory_space<vmem>>, vector<1x128x96xf32>
    %5 = vector.shape_cast %4 : vector<1x128x96xf32> to vector<128x96xf32>
    %c2_i32 = arith.constant 2 : i32
    %6 = tpu.dynamic_rotate %0 by %c2_i32 dim 1 : vector<96x256xf32>, i32 -> vector<96x256xf32>
    %cst_6 = arith.constant dense<0.000000e+00> : vector<128x256xf32>
    %7 = tpu.matmul %5, %6, %cst_6 {dimension_numbers = #tpu.dot_dimension_numbers<[1], [0], [0], [1], [0, 0, 1, 1], [], []>} : vector<128x96xf32>, vector<96x256xf32>, vector<128x256xf32> -> vector<128x256xf32>
    %8 = arith.addf %3, %7 : vector<128x256xf32>
    %c1 = arith.constant 1 : index
    %c0_7 = arith.constant 0 : index
    %c0_8 = arith.constant 0 : index
    %9 = vector.load %arg2[%c1, %c0_7, %c0_8] : memref<3x128x96xf32, #tpu.memory_space<vmem>>, vector<1x128x96xf32>
    %10 = vector.shape_cast %9 : vector<1x128x96xf32> to vector<128x96xf32>
    %c1_i32 = arith.constant 1 : i32
    %11 = tpu.dynamic_rotate %0 by %c1_i32 dim 1 : vector<96x256xf32>, i32 -> vector<96x256xf32>
    %cst_9 = arith.constant dense<0.000000e+00> : vector<128x256xf32>
    %12 = tpu.matmul %10, %11, %cst_9 {dimension_numbers = #tpu.dot_dimension_numbers<[1], [0], [0], [1], [0, 0, 1, 1], [], []>} : vector<128x96xf32>, vector<96x256xf32>, vector<128x256xf32> -> vector<128x256xf32>
    %13 = arith.addf %8, %12 : vector<128x256xf32>
    %c0_10 = arith.constant 0 : index
    %c0_11 = arith.constant 0 : index
    %c0_12 = arith.constant 0 : index
    %14 = vector.load %arg3[%c0_10, %c0_11, %c0_12] : memref<2x128x1xf32, #tpu.memory_space<vmem>>, vector<1x128x1xf32>
    %15 = vector.shape_cast %14 : vector<1x128x1xf32> to vector<128x1xf32>
    %16 = vector.broadcast %15 : vector<128x1xf32> to vector<128x256xf32>
    %17 = arith.addf %13, %16 : vector<128x256xf32>
    %cst_13 = arith.constant 0.000000e+00 : f32
    %18 = vector.broadcast %cst_13 : f32 to vector<128x256xf32>
    %19 = arith.cmpf ogt, %17, %18 : vector<128x256xf32>
    %cst_14 = arith.constant 0.00999999977 : f32
    %20 = vector.broadcast %cst_14 : f32 to vector<128x256xf32>
    %21 = arith.mulf %20, %17 : vector<128x256xf32>
    %22 = arith.select %19, %17, %21 : vector<128x256xi1>, vector<128x256xf32>
    %c0_15 = arith.constant 0 : index
    %c0_16 = arith.constant 0 : index
    %23 = vector.load %arg5[%c0_15, %c0_16] : memref<128x96xf32, #tpu.memory_space<vmem>>, vector<128x96xf32>
    %cst_17 = arith.constant dense<0.000000e+00> : vector<128x256xf32>
    %24 = tpu.matmul %23, %0, %cst_17 {dimension_numbers = #tpu.dot_dimension_numbers<[1], [0], [0], [1], [0, 0, 1, 1], [], []>} : vector<128x96xf32>, vector<96x256xf32>, vector<128x256xf32> -> vector<128x256xf32>
    %c1_18 = arith.constant 1 : index
    %c0_19 = arith.constant 0 : index
    %c0_20 = arith.constant 0 : index
    %25 = vector.load %arg3[%c1_18, %c0_19, %c0_20] : memref<2x128x1xf32, #tpu.memory_space<vmem>>, vector<1x128x1xf32>
    %26 = vector.shape_cast %25 : vector<1x128x1xf32> to vector<128x1xf32>
    %27 = vector.broadcast %26 : vector<128x1xf32> to vector<128x256xf32>
    %28 = arith.addf %24, %27 : vector<128x256xf32>
    %c0_21 = arith.constant 0 : index
    %c0_22 = arith.constant 0 : index
    %29 = vector.load %arg4[%c0_21, %c0_22] : memref<3x128xf32, #tpu.memory_space<vmem>>, vector<1x128xf32>
    %c1_23 = arith.constant 1 : index
    %c0_24 = arith.constant 0 : index
    %30 = vector.load %arg4[%c1_23, %c0_24] : memref<3x128xf32, #tpu.memory_space<vmem>>, vector<1x128xf32>
    %c2_25 = arith.constant 2 : index
    %c0_26 = arith.constant 0 : index
    %31 = vector.load %arg4[%c2_25, %c0_26] : memref<3x128xf32, #tpu.memory_space<vmem>>, vector<1x128xf32>
    %32 = vector.extract_strided_slice %22 {offsets = [0, 0], sizes = [128, 128], strides = [1, 1]} : vector<128x256xf32> to vector<128x128xf32>
    %33 = vector.broadcast %31 : vector<1x128xf32> to vector<128x128xf32>
    %34 = arith.mulf %32, %33 : vector<128x128xf32>
    %cst_27 = arith.constant dense<0.000000e+00> : vector<128xf32>
    %35 = vector.multi_reduction <add>, %34, %cst_27 [1] : vector<128x128xf32> to vector<128xf32>
    %36 = vector.shape_cast %35 : vector<128xf32> to vector<128x1xf32>
    %cst_28 = arith.constant 0.00847457629 : f32
    %37 = vector.broadcast %cst_28 : f32 to vector<128x1xf32>
    %38 = arith.mulf %36, %37 : vector<128x1xf32>
    %39 = vector.broadcast %38 : vector<128x1xf32> to vector<128x128xf32>
    %40 = arith.subf %32, %39 : vector<128x128xf32>
    %41 = vector.broadcast %31 : vector<1x128xf32> to vector<128x128xf32>
    %42 = arith.mulf %40, %41 : vector<128x128xf32>
    %43 = arith.mulf %42, %42 : vector<128x128xf32>
    %cst_29 = arith.constant dense<0.000000e+00> : vector<128xf32>
    %44 = vector.multi_reduction <add>, %43, %cst_29 [1] : vector<128x128xf32> to vector<128xf32>
    %45 = vector.shape_cast %44 : vector<128xf32> to vector<128x1xf32>
    %cst_30 = arith.constant 0.00847457629 : f32
    %46 = vector.broadcast %cst_30 : f32 to vector<128x1xf32>
    %47 = arith.mulf %45, %46 : vector<128x1xf32>
    %cst_31 = arith.constant 9.99999974E-6 : f32
    %48 = vector.broadcast %cst_31 : f32 to vector<128x1xf32>
    %49 = arith.addf %47, %48 : vector<128x1xf32>
    %50 = math.rsqrt %49 : vector<128x1xf32>
    %51 = vector.broadcast %50 : vector<128x1xf32> to vector<128x128xf32>
    %52 = arith.mulf %42, %51 : vector<128x128xf32>
    %53 = vector.broadcast %29 : vector<1x128xf32> to vector<128x128xf32>
    %54 = arith.mulf %52, %53 : vector<128x128xf32>
    %55 = vector.broadcast %30 : vector<1x128xf32> to vector<128x128xf32>
    %56 = arith.addf %54, %55 : vector<128x128xf32>
    %57 = vector.extract_strided_slice %28 {offsets = [0, 0], sizes = [128, 128], strides = [1, 1]} : vector<128x256xf32> to vector<128x128xf32>
    %58 = arith.addf %56, %57 : vector<128x128xf32>
    %cst_32 = arith.constant 0.000000e+00 : f32
    %59 = vector.broadcast %cst_32 : f32 to vector<128x128xf32>
    %60 = arith.maximumf %58, %59 : vector<128x128xf32>
    %61 = vector.broadcast %31 : vector<1x128xf32> to vector<128x128xf32>
    %62 = arith.mulf %60, %61 : vector<128x128xf32>
    %c0_33 = arith.constant 0 : index
    %c0_34 = arith.constant 0 : index
    %63 = vector.load %arg6[%c0_33, %c0_34] : memref<128x256xf32, #tpu.memory_space<vmem>>, vector<128x128xf32>
    tpu.vector_store %arg6[%c0_33, %c0_34], %62 {strides = array<i32>} : memref<128x256xf32, #tpu.memory_space<vmem>>, vector<128x128xf32>,
    %64 = vector.extract_strided_slice %22 {offsets = [0, 128], sizes = [128, 128], strides = [1, 1]} : vector<128x256xf32> to vector<128x128xf32>
    %65 = vector.broadcast %31 : vector<1x128xf32> to vector<128x128xf32>
    %66 = arith.mulf %64, %65 : vector<128x128xf32>
    %cst_35 = arith.constant dense<0.000000e+00> : vector<128xf32>
    %67 = vector.multi_reduction <add>, %66, %cst_35 [1] : vector<128x128xf32> to vector<128xf32>
    %68 = vector.shape_cast %67 : vector<128xf32> to vector<128x1xf32>
    %cst_36 = arith.constant 0.00847457629 : f32
    %69 = vector.broadcast %cst_36 : f32 to vector<128x1xf32>
    %70 = arith.mulf %68, %69 : vector<128x1xf32>
    %71 = vector.broadcast %70 : vector<128x1xf32> to vector<128x128xf32>
    %72 = arith.subf %64, %71 : vector<128x128xf32>
    %73 = vector.broadcast %31 : vector<1x128xf32> to vector<128x128xf32>
    %74 = arith.mulf %72, %73 : vector<128x128xf32>
    %75 = arith.mulf %74, %74 : vector<128x128xf32>
    %cst_37 = arith.constant dense<0.000000e+00> : vector<128xf32>
    %76 = vector.multi_reduction <add>, %75, %cst_37 [1] : vector<128x128xf32> to vector<128xf32>
    %77 = vector.shape_cast %76 : vector<128xf32> to vector<128x1xf32>
    %cst_38 = arith.constant 0.00847457629 : f32
    %78 = vector.broadcast %cst_38 : f32 to vector<128x1xf32>
    %79 = arith.mulf %77, %78 : vector<128x1xf32>
    %cst_39 = arith.constant 9.99999974E-6 : f32
    %80 = vector.broadcast %cst_39 : f32 to vector<128x1xf32>
    %81 = arith.addf %79, %80 : vector<128x1xf32>
    %82 = math.rsqrt %81 : vector<128x1xf32>
    %83 = vector.broadcast %82 : vector<128x1xf32> to vector<128x128xf32>
    %84 = arith.mulf %74, %83 : vector<128x128xf32>
    %85 = vector.broadcast %29 : vector<1x128xf32> to vector<128x128xf32>
    %86 = arith.mulf %84, %85 : vector<128x128xf32>
    %87 = vector.broadcast %30 : vector<1x128xf32> to vector<128x128xf32>
    %88 = arith.addf %86, %87 : vector<128x128xf32>
    %89 = vector.extract_strided_slice %28 {offsets = [0, 128], sizes = [128, 128], strides = [1, 1]} : vector<128x256xf32> to vector<128x128xf32>
    %90 = arith.addf %88, %89 : vector<128x128xf32>
    %cst_40 = arith.constant 0.000000e+00 : f32
    %91 = vector.broadcast %cst_40 : f32 to vector<128x128xf32>
    %92 = arith.maximumf %90, %91 : vector<128x128xf32>
    %93 = vector.broadcast %31 : vector<1x128xf32> to vector<128x128xf32>
    %94 = arith.mulf %92, %93 : vector<128x128xf32>
    %c0_41 = arith.constant 0 : index
    %c128 = arith.constant 128 : index
    %95 = vector.load %arg6[%c0_41, %c128] : memref<128x256xf32, #tpu.memory_space<vmem>>, vector<128x128xf32>
    tpu.vector_store %arg6[%c0_41, %c128], %94 {strides = array<i32>} : memref<128x256xf32, #tpu.memory_space<vmem>>, vector<128x128xf32>,
    return
  }
  func.func @transform_0(%arg0: i32) -> (i32, i32) {
    %c0_i32 = arith.constant 0 : i32
    %c0_i32_0 = arith.constant 0 : i32
    return %c0_i32, %arg0 : i32, i32
  }
  func.func @transform_1(%arg0: i32) -> (i32, i32, i32) {
    %c0_i32 = arith.constant 0 : i32
    %c0_i32_0 = arith.constant 0 : i32
    %c0_i32_1 = arith.constant 0 : i32
    %c0_i32_2 = arith.constant 0 : i32
    return %c0_i32, %c0_i32_0, %c0_i32_1 : i32, i32, i32
  }
  func.func @transform_2(%arg0: i32) -> (i32, i32, i32) {
    %c0_i32 = arith.constant 0 : i32
    %c0_i32_0 = arith.constant 0 : i32
    %c0_i32_1 = arith.constant 0 : i32
    %c0_i32_2 = arith.constant 0 : i32
    return %c0_i32, %c0_i32_0, %c0_i32_1 : i32, i32, i32
  }
  func.func @transform_3(%arg0: i32) -> (i32, i32) {
    %c0_i32 = arith.constant 0 : i32
    %c0_i32_0 = arith.constant 0 : i32
    %c0_i32_1 = arith.constant 0 : i32
    return %c0_i32, %c0_i32_0 : i32, i32
  }
  func.func @transform_4(%arg0: i32) -> (i32, i32) {
    %c0_i32 = arith.constant 0 : i32
    %c0_i32_0 = arith.constant 0 : i32
    %c0_i32_1 = arith.constant 0 : i32
    return %c0_i32, %c0_i32_0 : i32, i32
  }
  func.func @transform_5(%arg0: i32) -> (i32, i32) {
    %c0_i32 = arith.constant 0 : i32
    %c0_i32_0 = arith.constant 0 : i32
    return %c0_i32, %arg0 : i32, i32
  }
}

</mosaic_0001>

<bundles_post_ra>
// kernel: temporal_block.1
= control target key start
LH: loop header
LB: loop body
LE: loop exit
PB: predicated region body
PF: predicated region fallthrough
CT: control target
= control target key end

     0   :  { %s2768_s18 = smov 0   ;;  %s2770_s19 = smov 0   ;;  %s4458_s0 = inlined_call_operand.vmem [shape: f32[96,1024], index: 0, kind: input, shape index: {}]   ;;  %s4459_s1 = inlined_call_operand.vmem [shape: f32[3,128,96], index: 1, kind: input, shape index: {}]   ;;  %s4460_s2 = inlined_call_operand.vmem [shape: f32[2,128,1], index: 2, kind: input, shape index: {}]   ;;  %s4461_s3 = inlined_call_operand.vmem [shape: f32[3,128], index: 3, kind: input, shape index: {}]   ;;  %s4462_s4 = inlined_call_operand.vmem [shape: f32[128,96], index: 4, kind: input, shape index: {}]   ;;  %s4463_s5 = inlined_call_operand.vmem [shape: f32[128,1024], index: 5, kind: output, shape index: {}]  }
   0x1   :  { %s2772_s20 = smov 0  }
   0x2 LB: > { %s2483_s21 = sadd.s32 4294967295, %s2732_s20   ;;  %s2785_s22 = sadd.s32 1, %s2732_s20   ;;  %s2732_s20 = sphi %s2772_s20, %s4507_s20   ;;  %s2728_s19 = sphi %s2770_s19, %s4506_s19   ;;  %s2724_s18 = sphi %s2768_s18, %s4505_s18  }
   0x3   : > { %s19_s23 = ssub.s32 %s2732_s20, %s2785_s22  ;;  %s22_s24 = sadd.s32 1, %s2728_s19 }
   0x4   : > { %p20_p0 = scmp.eq.s32.totalorder %s19_s23, 0  ;;  %p29_p1 = scmp.ne.s32.totalorder %s2728_s19, %s2724_s18 }
   0x5   : > { %p30_p2 = scmp.eq.s32.totalorder %s2732_s20, 0  ;;  %p143_p3 = scmp.eq.s32.totalorder %s2483_s21, 3 }
   0x6   : > { %s2796_s25 = scalar_select %p20_p0, %s2728_s19, %s22_s24  }
   0x7   : > { %p31_p4 = por %p30_p2, %p29_p1  ;;  %p2798_p5 = por %p143_p3, %p29_p1 }
   0x8   : > { %p2486_p6 = scmp.ge.s32.totalorder %s2732_s20, 4 }
   0xa   : > { %177 = sbr.rel (%p2486_p6) target bundleno = 31 (0x1f), region = 32 }
   0xf   : > { %180 = sbr.rel (!%p31_p4) target bundleno = 31 (0x1f), region = 36  ;;  %s182_s27 = sand.u32 (%p31_p4), 1, %s2728_s19  }
  0x10   : > { %s2611_s28 = sshll.u32 (%p31_p4), %s2732_s20, 4  ;;  %s2613_s29 = smul.u32 (%p31_p4), 192, %s182_s27 }
  0x11   : > { %s2808_s7 = scalar_lea.vmem (%p31_p4), %s4458_s0, %s2611_s28 }
  0x12   : > { %v200_v0 = vld [vmem:[%s2808_s7] sm:$0xff] (%p31_p4)  ;;  %v202_v1 = vld [vmem:[%s2808_s7 + $0x8] sm:$0xff] (%p31_p4)  ;;  %s2816_s8 = scalar_lea.vmem (%p31_p4), [#allocation2], %s2613_s29 }
  0x13   : > { %v204_v2 = vld [vmem:[%s2808_s7 + $0x40] sm:$0xff] (%p31_p4)  ;;  %v206_v3 = vld [vmem:[%s2808_s7 + $0x48] sm:$0xff] (%p31_p4)  ;;  %201 = vst [vmem:[%s2816_s8] sm:$0xff] (%p31_p4), %v200_v0  ;;  %203 = vst [vmem:[%s2816_s8 + $0x8] sm:$0xff] (%p31_p4), %v202_v1 }
  0x14   : > { %v208_v4 = vld [vmem:[%s2808_s7 + $0x80] sm:$0xff]  ;;  %v210_v5 = vld [vmem:[%s2808_s7 + $0x88] sm:$0xff]  ;;  %205 = vst [vmem:[%s2816_s8 + $0x10] sm:$0xff] %v204_v2  ;;  %207 = vst [vmem:[%s2816_s8 + $0x18] sm:$0xff] %v206_v3 }
  0x15   : > { %209 = vst [vmem:[%s2816_s8 + $0x20] sm:$0xff] %v208_v4  ;;  %211 = vst [vmem:[%s2816_s8 + $0x28] sm:$0xff] %v210_v5  ;;  %v212_v6 = vld [vmem:[%s2808_s7 + $0xc0] sm:$0xff]  ;;  %v214_v7 = vld [vmem:[%s2808_s7 + $0xc8] sm:$0xff] }
  0x16   : > { %v216_v8 = vld [vmem:[%s2808_s7 + $0x100] sm:$0xff]  ;;  %213 = vst [vmem:[%s2816_s8 + $0x30] sm:$0xff] %v212_v6  ;;  %215 = vst [vmem:[%s2816_s8 + $0x38] sm:$0xff] %v214_v7  ;;  %v218_v9 = vld [vmem:[%s2808_s7 + $0x108] sm:$0xff] }
  0x17   : > { %217 = vst [vmem:[%s2816_s8 + $0x40] sm:$0xff] %v216_v8  ;;  %v220_v10 = vld [vmem:[%s2808_s7 + $0x140] sm:$0xff]  ;;  %v222_v11 = vld [vmem:[%s2808_s7 + $0x148] sm:$0xff]  ;;  %219 = vst [vmem:[%s2816_s8 + $0x48] sm:$0xff] %v218_v9 }
  0x18   : > { %221 = vst [vmem:[%s2816_s8 + $0x50] sm:$0xff] %v220_v10  ;;  %223 = vst [vmem:[%s2816_s8 + $0x58] sm:$0xff] %v222_v11  ;;  %v224_v12 = vld [vmem:[%s2808_s7 + $0x180] sm:$0xff]  ;;  %v226_v13 = vld [vmem:[%s2808_s7 + $0x188] sm:$0xff] }
  0x19   : > { %v228_v14 = vld [vmem:[%s2808_s7 + $0x1c0] sm:$0xff]  ;;  %225 = vst [vmem:[%s2816_s8 + $0x60] sm:$0xff] %v224_v12  ;;  %227 = vst [vmem:[%s2816_s8 + $0x68] sm:$0xff] %v226_v13  ;;  %v230_v15 = vld [vmem:[%s2808_s7 + $0x1c8] sm:$0xff] }
  0x1a   : > { %229 = vst [vmem:[%s2816_s8 + $0x70] sm:$0xff] %v228_v14  ;;  %v232_v16 = vld [vmem:[%s2808_s7 + $0x200] sm:$0xff]  ;;  %v234_v17 = vld [vmem:[%s2808_s7 + $0x208] sm:$0xff]  ;;  %231 = vst [vmem:[%s2816_s8 + $0x78] sm:$0xff] %v230_v15 }
  0x1b   : > { %233 = vst [vmem:[%s2816_s8 + $0x80] sm:$0xff] %v232_v16  ;;  %235 = vst [vmem:[%s2816_s8 + $0x88] sm:$0xff] %v234_v17  ;;  %v236_v18 = vld [vmem:[%s2808_s7 + $0x240] sm:$0xff]  ;;  %v238_v19 = vld [vmem:[%s2808_s7 + $0x248] sm:$0xff] }
  0x1c   : > { %v240_v20 = vld [vmem:[%s2808_s7 + $0x280] sm:$0xff]  ;;  %237 = vst [vmem:[%s2816_s8 + $0x90] sm:$0xff] %v236_v18  ;;  %239 = vst [vmem:[%s2816_s8 + $0x98] sm:$0xff] %v238_v19  ;;  %v242_v21 = vld [vmem:[%s2808_s7 + $0x288] sm:$0xff] }
  0x1d   : > { %241 = vst [vmem:[%s2816_s8 + $0xa0] sm:$0xff] %v240_v20  ;;  %v244_v22 = vld [vmem:[%s2808_s7 + $0x2c0] sm:$0xff]  ;;  %v246_v23 = vld [vmem:[%s2808_s7 + $0x2c8] sm:$0xff]  ;;  %243 = vst [vmem:[%s2816_s8 + $0xa8] sm:$0xff] %v242_v21 }
  0x1e   : > { %245 = vst [vmem:[%s2816_s8 + $0xb0] sm:$0xff] %v244_v22  ;;  %247 = vst [vmem:[%s2816_s8 + $0xb8] sm:$0xff] %v246_v23 }
  0x1f PF: > { %p2489_p7 = scmp.ge.s32.totalorder %s2732_s20, 1  ;;  %p252_p8 = scmp.lt.s32.totalorder %s2732_s20, 5 }
  0x21   : > { %p253_p9 = pnand %p2489_p7, %p252_p8 }
  0x23   : > { %256 = sbr.rel (%p253_p9) target bundleno = 867 (0x363), region = 59 }
  0x28   : > { %s259_s9 = sand.u32 1, %s2724_s18   ;;  %v4464_v24 = vmov 0.0   ;;  %s2735_s12 = smov 2   ;;  %v2491_v49 = vld [vmem:[%s4459_s1 + $0x100] sm:$0xff]  ;;  %vm419_vm0 = vcmask 785408   ;;  %v2492_v50 = vld [vmem:[%s4459_s1 + $0x108] sm:$0xff]  ;;  %v392_v5 = vlaneseq }
  0x29   : > { %s2614_s10 = smul.u32 192, %s259_s9  ;;  %741 = vmatprep.mubr.f32.mxu1 %v4464_v24  ;;  %532 = vmatprep.mubr.f32.mxu0 %v4464_v24  ;;  %v2493_v51 = vld [vmem:[%s4459_s1 + $0x110] sm:$0xff]  ;;  %v2494_v52 = vld [vmem:[%s4459_s1 + $0x118] sm:$0xff]  ;;  %v2495_v53 = vld [vmem:[%s4459_s1 + $0x120] sm:$0xff]  ;;  %s2736_s30 = smov 1   ;;  %v2737_v14 = vmov 0  }
  0x2a   : > { %v2496_v54 = vld [vmem:[%s4459_s1 + $0x128] sm:$0xff]  ;;  %v2497_v55 = vld [vmem:[%s4459_s1 + $0x130] sm:$0xff]  ;;  %v2498_v56 = vld [vmem:[%s4459_s1 + $0x138] sm:$0xff]  ;;  %v3188_v7 = vand.u32 127, %v392_v5  ;;  %2644 = vset.pattern.permute.xlu1 %v2737_v14  ;;  %2643 = vset.pattern.permute.xlu0 %v2737_v14  ;;  %s4147_s8 = sshll.u32 %s259_s9, 8 }
  0x2b   : > { %s2867_s11 = scalar_lea.vmem [#allocation2], %s2614_s10  ;;  %v2499_v57 = vld [vmem:[%s4459_s1 + $0x140] sm:$0xff]  ;;  %v2500_v58 = vld [vmem:[%s4459_s1 + $0x148] sm:$0xff]  ;;  %v2501_v59 = vld [vmem:[%s4459_s1 + $0x150] sm:$0xff]  ;;  %s4183_s10 = scalar_lea.vmem [#allocation3], %s4147_s8 }
  0x2c   : > { %v2870_v25 = vld [vmem:[%s2867_s11 + $0xb0] sm:$0xff]  ;;  %v2873_v26 = vld [vmem:[%s2867_s11 + $0xa0] sm:$0xff]  ;;  %v2880_v27 = vld [vmem:[%s2867_s11 + $0xb8] sm:$0xff]  ;;  %vm394_vm1 = vcmp.lt.s32.totalorder %v3188_v7, 2  ;;  %vm903_vm2 = vcmp.lt.s32.totalorder %v3188_v7, 1 }
  0x2d   : > { %366 = vrot.lane.b32.xlu0 %v2870_v25, %s2735_s12  ;;  %364 = vrot.lane.b32.xlu1 %v2873_v26, %s2735_s12  ;;  %v2883_v28 = vld [vmem:[%s2867_s11 + $0xa8] sm:$0xff]  ;;  %v2893_v29 = vld [vmem:[%s2867_s11 + $0x98] sm:$0xff] }
  0x2e   : > { %685 = vmatprep.subr.mxu1 %v2880_v27  ;;  %v2896_v30 = vld [vmem:[%s2867_s11 + $0x90] sm:$0xff]  ;;  %v2906_v31 = vld [vmem:[%s2867_s11 + $0x88] sm:$0xff]  ;;  %v2909_v32 = vld [vmem:[%s2867_s11 + $0x80] sm:$0xff] }
  0x2f   : > { %686 = vmatpush1.msra.mxu1 %v2870_v25  ;;  %v2913_v33 = vld [vmem:[%s2867_s11 + $0x78] sm:$0xff]  ;;  %v2922_v34 = vld [vmem:[%s2867_s11 + $0x70] sm:$0xff]  ;;  %v2925_v35 = vld [vmem:[%s2867_s11 + $0x68] sm:$0xff] }
  0x30   : > { %687 = vmatprep.subr.mxu1 %v2883_v28  ;;  %v2929_v36 = vld [vmem:[%s2867_s11 + $0x60] sm:$0xff]  ;;  %v2938_v37 = vld [vmem:[%s2867_s11 + $0x58] sm:$0xff]  ;;  %v2941_v38 = vld [vmem:[%s2867_s11 + $0x50] sm:$0xff] }
  0x31   : > { %390 = vrot.lane.b32.xlu0 %v2880_v27, %s2735_s12  ;;  %388 = vrot.lane.b32.xlu1 %v2883_v28, %s2735_s12  ;;  %v2945_v39 = vld [vmem:[%s2867_s11 + $0x48] sm:$0xff]  ;;  %v2954_v40 = vld [vmem:[%s2867_s11 + $0x40] sm:$0xff] }
  0x32   : > { %688 = vmatpush1.msra.mxu1 %v2873_v26  ;;  %v2957_v41 = vld [vmem:[%s2867_s11 + $0x38] sm:$0xff]  ;;  %v2961_v42 = vld [vmem:[%s2867_s11 + $0x30] sm:$0xff]  ;;  %v2970_v43 = vld [vmem:[%s2867_s11 + $0x28] sm:$0xff] }
  0x33   : > { %689 = vmatprep.subr.mxu1 %v2893_v29  ;;  %v2973_v44 = vld [vmem:[%s2867_s11 + $0x20] sm:$0xff]  ;;  %v2977_v45 = vld [vmem:[%s2867_s11 + $0x18] sm:$0xff]  ;;  %v2986_v46 = vld [vmem:[%s2867_s11 + $0x10] sm:$0xff] }
  0x34   : > { %690 = vmatpush1.msra.mxu1 %v2896_v30  ;;  %v2989_v47 = vld [vmem:[%s2867_s11 + $0x8] sm:$0xff]  ;;  %v2993_v48 = vld [vmem:[%s2867_s11] sm:$0xff]  ;;  %v2502_v60 = vld [vmem:[%s4459_s1 + $0x158] sm:$0xff]  ;;  %s2612_s11 = sshll.u32 (%p2798_p5), %s2483_s21, 4 }
  0x35   : > { %386 = vrot.lane.b32.xlu1 %v2893_v29, %s2735_s12  ;;  %362 = vrot.lane.b32.xlu0 %v2896_v30, %s2735_s12  ;;  %v2503_v61 = vld [vmem:[%s4459_s1 + $0x160] sm:$0xff]  ;;  %v2504_v62 = vld [vmem:[%s4459_s1 + $0x168] sm:$0xff]  ;;  %s4385_s26 = scalar_lea.vmem (%p2798_p5), %s4463_s5, %s2612_s11 }
  0x36   : > { %691 = vmatprep.subr.mxu1 %v2906_v31  ;;  %v2505_v63 = vld [vmem:[%s4459_s1 + $0x170] sm:$0xff]  ;;  %v2506_v0 = vld [vmem:[%s4459_s1 + $0x178] sm:$0xff]  ;;  %v1393_v1 = vld [vmem:[%s4462_s4] sm:$0xff] }
  0x37   : > { %692 = vmatpush1.msra.mxu1 %v2909_v32  ;;  %v1394_v2 = vld [vmem:[%s4462_s4 + $0x8] sm:$0xff]  ;;  %v1395_v3 = vld [vmem:[%s4462_s4 + $0x10] sm:$0xff]  ;;  %v1396_v4 = vld [vmem:[%s4462_s4 + $0x18] sm:$0xff] }
  0x38   : > { %693 = vmatprep.subr.mxu1 %v2913_v33  ;;  %v1397_v6 = vld [vmem:[%s4462_s4 + $0x20] sm:$0xff]  ;;  %v1398_v10 = vld [vmem:[%s4462_s4 + $0x28] sm:$0xff]  ;;  %v1399_v13 = vld [vmem:[%s4462_s4 + $0x30] sm:$0xff] }
  0x39   : > { %384 = vrot.lane.b32.xlu1 %v2906_v31, %s2735_s12  ;;  %360 = vrot.lane.b32.xlu0 %v2909_v32, %s2735_s12  ;;  %v1170_v15 = vld [vmem:[%s4460_s2 + $0x8] sm:$0xff]  ;;  %v1400_v22 = vld [vmem:[%s4462_s4 + $0x38] sm:$0xff] }
  0x3a   : > { %694 = vmatpush1.msra.mxu1 %v2922_v34  ;;  %v1171_v23 = vld [vmem:[%s4460_s2 + $0x10] sm:$0xff]  ;;  %v2572_v14 = vld [vmem:[%s4460_s2 + $0x88] sm:$0xff]  ;;  %v343_v7 = vld [vmem:[%s4459_s1 + $0x78] sm:$0xff] }
  0x3b   : > { %695 = vmatprep.subr.mxu1 %v2925_v35 }
  0x3c   : > { %696 = vmatpush1.msra.mxu1 %v2929_v36 }
  0x3d   : > { %382 = vrot.lane.b32.xlu1 %v2913_v33, %s2735_s12  ;;  %358 = vrot.lane.b32.xlu0 %v2922_v34, %s2735_s12 }
  0x3e   : > { %697 = vmatprep.subr.mxu1 %v2938_v37 }
  0x3f   : > { %698 = vmatpush1.msra.mxu1 %v2941_v38 }
  0x40   : > { %699 = vmatprep.subr.mxu1 %v2945_v39 }
  0x41   : > { %380 = vrot.lane.b32.xlu1 %v2925_v35, %s2735_s12  ;;  %356 = vrot.lane.b32.xlu0 %v2929_v36, %s2735_s12 }
  0x42   : > { %700 = vmatpush1.msra.mxu1 %v2954_v40 }
  0x43   : > { %701 = vmatprep.subr.mxu1 %v2957_v41 }
  0x44   : > { %702 = vmatpush1.msra.mxu1 %v2961_v42 }
  0x45   : > { %378 = vrot.lane.b32.xlu1 %v2938_v37, %s2735_s12  ;;  %354 = vrot.lane.b32.xlu0 %v2941_v38, %s2735_s12 }
  0x46   : > { %703 = vmatprep.subr.mxu1 %v2970_v43 }
  0x47   : > { %704 = vmatpush1.msra.mxu1 %v2973_v44 }
  0x48   : > { %705 = vmatprep.subr.mxu1 %v2977_v45 }
  0x49   : > { %376 = vrot.lane.b32.xlu1 %v2945_v39, %s2735_s12  ;;  %352 = vrot.lane.b32.xlu0 %v2954_v40, %s2735_s12 }
  0x4a   : > { %706 = vmatpush1.msra.mxu1 %v2986_v46 }
  0x4b   : > { %707 = vmatprep.subr.mxu1 %v2989_v47 }
  0x4c   : > { %708 = vmatpush1.msra.mxu1 %v2993_v48 }
  0x4d   : > { %374 = vrot.lane.b32.xlu1 %v2957_v41, %s2735_s12  ;;  %350 = vrot.lane.b32.xlu0 %v2961_v42, %s2735_s12 }
  0x4e   : > { %2523 = vmatmul.mubr.msk.f32.vlgmr.msra.gmra.mxu1 %vm419_vm0, %v2491_v49  ;;  %1562 = vmatprep.subr.mxu1 %v2880_v27 }
  0x4f   : > { %747 = vmatprep.mubr.f32.mxu1 %v4464_v24  ;;  %1563 = vmatpush1.msra.mxu1 %v2870_v25 }
  0x50   : > { %1564 = vmatprep.subr.mxu1 %v2883_v28 }
  0x51   : > { %372 = vrot.lane.b32.xlu1 %v2970_v43, %s2735_s12  ;;  %348 = vrot.lane.b32.xlu0 %v2973_v44, %s2735_s12 }
  0x52   : > { %2524 = vmatmul.mubr.msk.f32.gmra.mxu1 %vm419_vm0, %v2492_v50 }
  0x53   : > { %753 = vmatprep.mubr.f32.mxu1 %v4464_v24  ;;  %1565 = vmatpush1.msra.mxu1 %v2873_v26 }
  0x54   : > { %1566 = vmatprep.subr.mxu1 %v2893_v29 }
  0x55   : > { %370 = vrot.lane.b32.xlu1 %v2977_v45, %s2735_s12  ;;  %346 = vrot.lane.b32.xlu0 %v2986_v46, %s2735_s12 }
  0x56   : > { %2525 = vmatmul.mubr.msk.f32.gmra.mxu1 %vm419_vm0, %v2493_v51  ;;  %v1404_v51 = vld [vmem:[%s4462_s4 + $0x58] sm:$0xff] }
  0x57   : > { %759 = vmatprep.mubr.f32.mxu1 %v4464_v24  ;;  %1567 = vmatpush1.msra.mxu1 %v2896_v30 }
  0x58   : > { %1568 = vmatprep.subr.mxu1 %v2906_v31 }
  0x59   : > { %368 = vrot.lane.b32.xlu1 %v2989_v47, %s2735_s12  ;;  %344 = vrot.lane.b32.xlu0 %v2993_v48, %s2735_s12 }
  0x5a   : > { %2526 = vmatmul.mubr.msk.f32.gmra.mxu1 %vm419_vm0, %v2494_v52  ;;  %v1179_v52 = vld [vmem:[%s4460_s2 + $0x50] sm:$0xff] }
  0x5b   : > { %765 = vmatprep.mubr.f32.mxu1 %v4464_v24  ;;  %1569 = vmatpush1.msra.mxu1 %v2909_v32 }
  0x5c   : > { %1570 = vmatprep.subr.mxu1 %v2913_v33 }
  0x5d   : > { %901 = vrot.lane.b32.xlu1 %v2880_v27, %s2736_s30  ;;  %877 = vrot.lane.b32.xlu0 %v2870_v25, %s2736_s30  ;;  %v1169_v25 = vld [vmem:[%s4460_s2] sm:$0xff] }
  0x5e   : > { %2527 = vmatmul.mubr.msk.f32.gmra.mxu1 %vm419_vm0, %v2495_v53  ;;  %v1178_v53 = vld [vmem:[%s4460_s2 + $0x48] sm:$0xff] }
  0x5f   : > { %771 = vmatprep.mubr.f32.mxu1 %v4464_v24  ;;  %1571 = vmatpush1.msra.mxu1 %v2922_v34 }
  0x60   : > { %1572 = vmatprep.subr.mxu1 %v2925_v35 }
  0x61   : > { %899 = vrot.lane.b32.xlu1 %v2883_v28, %s2736_s30  ;;  %875 = vrot.lane.b32.xlu0 %v2873_v26, %s2736_s30 }
  0x62   : > { %2528 = vmatmul.mubr.msk.f32.gmra.mxu1 %vm419_vm0, %v2496_v54 }
  0x63   : > { %777 = vmatprep.mubr.f32.mxu1 %v4464_v24  ;;  %1573 = vmatpush1.msra.mxu1 %v2929_v36 }
  0x64   : > { %1574 = vmatprep.subr.mxu1 %v2938_v37 }
  0x65   : > { %897 = vrot.lane.b32.xlu1 %v2893_v29, %s2736_s30  ;;  %873 = vrot.lane.b32.xlu0 %v2896_v30, %s2736_s30  ;;  %v1401_v30 = vld [vmem:[%s4462_s4 + $0x40] sm:$0xff] }
  0x66   : > { %2529 = vmatmul.mubr.msk.f32.gmra.mxu1 %vm419_vm0, %v2497_v55 }
  0x67   : > { %783 = vmatprep.mubr.f32.mxu1 %v4464_v24  ;;  %1575 = vmatpush1.msra.mxu1 %v2941_v38 }
  0x68   : > { %1576 = vmatprep.subr.mxu1 %v2945_v39 }
  0x69   : > { %895 = vrot.lane.b32.xlu1 %v2906_v31, %s2736_s30  ;;  %871 = vrot.lane.b32.xlu0 %v2909_v32, %s2736_s30  ;;  %v1173_v31 = vld [vmem:[%s4460_s2 + $0x20] sm:$0xff]  ;;  %v1172_v32 = vld [vmem:[%s4460_s2 + $0x18] sm:$0xff] }
  0x6a   : > { %2530 = vmatmul.mubr.msk.f32.gmra.mxu1 %vm419_vm0, %v2498_v56 }
  0x6b   : > { %789 = vmatprep.mubr.f32.mxu1 %v4464_v24  ;;  %1577 = vmatpush1.msra.mxu1 %v2954_v40 }
  0x6c   : > { %1578 = vmatprep.subr.mxu1 %v2957_v41 }
  0x6d   : > { %893 = vrot.lane.b32.xlu1 %v2913_v33, %s2736_s30  ;;  %869 = vrot.lane.b32.xlu0 %v2922_v34, %s2736_s30 }
  0x6e   : > { %2531 = vmatmul.mubr.msk.f32.gmra.mxu1 %vm419_vm0, %v2499_v57 }
  0x6f   : > { %795 = vmatprep.mubr.f32.mxu1 %v4464_v24  ;;  %1579 = vmatpush1.msra.mxu1 %v2961_v42 }
  0x70   : > { %1580 = vmatprep.subr.mxu1 %v2970_v43 }
  0x71   : > { %891 = vrot.lane.b32.xlu1 %v2925_v35, %s2736_s30  ;;  %867 = vrot.lane.b32.xlu0 %v2929_v36, %s2736_s30 }
  0x72   : > { %2532 = vmatmul.mubr.msk.f32.gmra.mxu1 %vm419_vm0, %v2500_v58  ;;  %v1181_v58 = vld [vmem:[%s4460_s2 + $0x60] sm:$0xff] }
  0x73   : > { %801 = vmatprep.mubr.f32.mxu1 %v4464_v24  ;;  %1581 = vmatpush1.msra.mxu1 %v2973_v44 }
  0x74   : > { %1582 = vmatprep.subr.mxu1 %v2977_v45 }
  0x75   : > { %889 = vrot.lane.b32.xlu1 %v2938_v37, %s2736_s30  ;;  %865 = vrot.lane.b32.xlu0 %v2941_v38, %s2736_s30  ;;  %v1402_v37 = vld [vmem:[%s4462_s4 + $0x48] sm:$0xff]  ;;  %v1175_v38 = vld [vmem:[%s4460_s2 + $0x30] sm:$0xff] }
  0x76   : > { %2533 = vmatmul.mubr.msk.f32.gmra.mxu1 %vm419_vm0, %v2501_v59  ;;  %v1180_v59 = vld [vmem:[%s4460_s2 + $0x58] sm:$0xff] }
  0x77   : > { %807 = vmatprep.mubr.f32.mxu1 %v4464_v24  ;;  %1583 = vmatpush1.msra.mxu1 %v2986_v46 }
  0x78   : > { %1584 = vmatprep.subr.mxu1 %v2989_v47 }
  0x79   : > { %887 = vrot.lane.b32.xlu1 %v2945_v39, %s2736_s30  ;;  %863 = vrot.lane.b32.xlu0 %v2954_v40, %s2736_s30  ;;  %v1174_v39 = vld [vmem:[%s4460_s2 + $0x28] sm:$0xff] }
  0x7a   : > { %2534 = vmatmul.mubr.msk.f32.gmra.mxu1 %vm419_vm0, %v2502_v60 }
  0x7b   : > { %813 = vmatprep.mubr.f32.mxu1 %v4464_v24  ;;  %1585 = vmatpush1.msra.mxu1 %v2993_v48 }
  0x7d   : > { %885 = vrot.lane.b32.xlu1 %v2957_v41, %s2736_s30  ;;  %861 = vrot.lane.b32.xlu0 %v2961_v42, %s2736_s30 }
  0x7e   : > { %2535 = vmatmul.mubr.msk.f32.gmra.mxu1 %vm419_vm0, %v2503_v61 }
  0x7f   : > { %819 = vmatprep.mubr.f32.mxu1 %v4464_v24 }
  0x81   : > { %883 = vrot.lane.b32.xlu1 %v2970_v43, %s2736_s30  ;;  %859 = vrot.lane.b32.xlu0 %v2973_v44, %s2736_s30  ;;  %v1403_v44 = vld [vmem:[%s4462_s4 + $0x50] sm:$0xff] }
  0x82   : > { %2536 = vmatmul.mubr.msk.f32.gmra.mxu1 %vm419_vm0, %v2504_v62 }
  0x83   : > { %825 = vmatprep.mubr.f32.mxu1 %v4464_v24 }
  0x85   : > { %881 = vrot.lane.b32.xlu1 %v2977_v45, %s2736_s30  ;;  %857 = vrot.lane.b32.xlu0 %v2986_v46, %s2736_s30  ;;  %v1177_v45 = vld [vmem:[%s4460_s2 + $0x40] sm:$0xff]  ;;  %v1176_v46 = vld [vmem:[%s4460_s2 + $0x38] sm:$0xff] }
  0x86   : > { %2537 = vmatmul.mubr.msk.f32.gmra.mxu1 %vm419_vm0, %v2505_v63 }
  0x87   : > { %831 = vmatprep.mubr.f32.mxu1 %v4464_v24 }
  0x89   : > { %879 = vrot.lane.b32.xlu1 %v2989_v47, %s2736_s30  ;;  %855 = vrot.lane.b32.xlu0 %v2993_v48, %s2736_s30 }
  0x8a   : > { %2538 = vmatmul.mubr.msk.f32.gmra.mxu1 %vm419_vm0, %v2506_v0  ;;  %v1183_v0 = vld [vmem:[%s4460_s2 + $0x70] sm:$0xff] }
  0x8b   : > { %1618 = vmatprep.mubr.f32.mxu1 %v4464_v24 }
  0x8d   : > { %1192 = vperm.xlu1 %2644, %v1170_v15   ;;  %1187 = vperm.xlu0 %2643, %v1169_v25   ;;  %v2577_v25 = vld [vmem:[%s4460_s2 + $0xb0] sm:$0xff] }
  0x8e   : > { %2587 = vmatmul.mubr.msk.f32.vlgmr.msra.gmra.mxu1 %vm419_vm0, %v1393_v1  ;;  %v1182_v1 = vld [vmem:[%s4460_s2 + $0x68] sm:$0xff] }
  0x8f   : > { %1624 = vmatprep.mubr.f32.mxu1 %v4464_v24 }
  0x91   : > { %1197 = vperm.xlu1 %2644, %v1171_v23   ;;  %1202 = vperm.xlu0 %2643, %v1172_v32   ;;  %v328_v23 = vld [vmem:[%s4459_s1] sm:$0xff]  ;;  %v2578_v32 = vld [vmem:[%s4460_s2 + $0xb8] sm:$0xff] }
  0x92   : > { %2588 = vmatmul.mubr.msk.f32.gmra.mxu1 %vm419_vm0, %v1394_v2 }
  0x93   : > { %1630 = vmatprep.mubr.f32.mxu1 %v4464_v24 }
  0x95   : > { %1207 = vperm.xlu1 %2644, %v1173_v31   ;;  %1212 = vperm.xlu0 %2643, %v1174_v39   ;;  %v329_v31 = vld [vmem:[%s4459_s1 + $0x8] sm:$0xff] }
  0x96   : > { %2589 = vmatmul.mubr.msk.f32.gmra.mxu1 %vm419_vm0, %v1395_v3  ;;  %v2580_v39 = vld [vmem:[%s4460_s2 + $0xc8] sm:$0xff] }
  0x97   : > { %1636 = vmatprep.mubr.f32.mxu1 %v4464_v24 }
  0x99   : > { %1217 = vperm.xlu1 %2644, %v1175_v38   ;;  %1222 = vperm.xlu0 %2643, %v1176_v46   ;;  %v2581_v46 = vld [vmem:[%s4460_s2 + $0xd0] sm:$0xff] }
  0x9a   : > { %2590 = vmatmul.mubr.msk.f32.gmra.mxu1 %vm419_vm0, %v1396_v4 }
  0x9b   : > { %1642 = vmatprep.mubr.f32.mxu1 %v4464_v24 }
  0x9d   : > { %1227 = vperm.xlu1 %2644, %v1177_v45   ;;  %1232 = vperm.xlu0 %2643, %v1178_v53  }
  0x9e   : > { %2591 = vmatmul.mubr.msk.f32.gmra.mxu1 %vm419_vm0, %v1397_v6  ;;  %v2571_v6 = vld [vmem:[%s4460_s2 + $0x80] sm:$0xff] }
  0x9f   : > { %v367_v8 = vpop.permute.xlu0 %366  ;;  %v365_v9 = vpop.permute.xlu1 %364  ;;  %1648 = vmatprep.mubr.f32.mxu1 %v4464_v24 }
  0xa1   : > { %1237 = vperm.xlu1 %2644, %v1179_v52   ;;  %1242 = vperm.xlu0 %2643, %v1180_v59   ;;  %v334_v59 = vld [vmem:[%s4459_s1 + $0x30] sm:$0xff] }
  0xa2   : > { %2592 = vmatmul.mubr.msk.f32.gmra.mxu1 %vm419_vm0, %v1398_v10 }
  0xa3   : > { %v391_v11 = vpop.permute.xlu0 %390  ;;  %v389_v12 = vpop.permute.xlu1 %388  ;;  %1654 = vmatprep.mubr.f32.mxu1 %v4464_v24 }
  0xa4   : > { %v406_v16 = vsel %vm394_vm1, %v367_v8, %v391_v11  ;;  %v418_v17 = vsel %vm394_vm1, %v391_v11, %v367_v8  ;;  %v405_v18 = vsel %vm394_vm1, %v365_v9, %v389_v12  ;;  %v417_v21 = vsel %vm394_vm1, %v389_v12, %v365_v9  ;;  %v1184_v8 = vld [vmem:[%s4460_s2 + $0x78] sm:$0xff] }
  0xa5   : > { %476 = vmatprep.subr.mxu0 %v406_v16  ;;  %1247 = vperm.xlu1 %2644, %v1181_v58  }
  0xa6   : > { %477 = vmatpush1.msra.mxu0 %v418_v17  ;;  %2593 = vmatmul.mubr.msk.f32.gmra.mxu1 %vm419_vm0, %v1399_v13  ;;  %v2573_v13 = vld [vmem:[%s4460_s2 + $0x90] sm:$0xff] }
  0xa7   : > { %478 = vmatprep.subr.mxu0 %v405_v18  ;;  %v387_v19 = vpop.permute.xlu1 %386  ;;  %v363_v20 = vpop.permute.xlu0 %362  ;;  %1660 = vmatprep.mubr.f32.mxu1 %v4464_v24 }
  0xa8   : > { %479 = vmatpush1.msra.mxu0 %v417_v21  ;;  %v404_v26 = vsel %vm394_vm1, %v363_v20, %v387_v19  ;;  %v416_v27 = vsel %vm394_vm1, %v387_v19, %v363_v20  ;;  %1252 = vperm.xlu0 %2643, %v1182_v1   ;;  %v2575_v19 = vld [vmem:[%s4460_s2 + $0xa0] sm:$0xff]  ;;  %v2574_v20 = vld [vmem:[%s4460_s2 + $0x98] sm:$0xff] }
  0xa9   : > { %480 = vmatprep.subr.mxu0 %v404_v26  ;;  %1257 = vperm.xlu1 %2644, %v1183_v0   ;;  %v2576_v26 = vld [vmem:[%s4460_s2 + $0xa8] sm:$0xff]  ;;  %v335_v0 = vld [vmem:[%s4459_s1 + $0x38] sm:$0xff] }
  0xaa   : > { %481 = vmatpush1.msra.mxu0 %v416_v27  ;;  %2594 = vmatmul.mubr.msk.f32.gmra.mxu1 %vm419_vm0, %v1400_v22 }
  0xab   : > { %v385_v28 = vpop.permute.xlu1 %384  ;;  %v361_v29 = vpop.permute.xlu0 %360  ;;  %1666 = vmatprep.mubr.f32.mxu1 %v4464_v24 }
  0xac   : > { %v403_v33 = vsel %vm394_vm1, %v361_v29, %v385_v28  ;;  %v415_v34 = vsel %vm394_vm1, %v385_v28, %v361_v29  ;;  %1262 = vperm.xlu0 %2643, %v1184_v8  }
  0xad   : > { %482 = vmatprep.subr.mxu0 %v403_v33  ;;  %1428 = vperm.xlu1 %2644, %v2571_v6   ;;  %v2579_v33 = vld [vmem:[%s4460_s2 + $0xc0] sm:$0xff] }
  0xae   : > { %483 = vmatpush1.msra.mxu0 %v415_v34  ;;  %2595 = vmatmul.mubr.msk.f32.gmra.mxu1 %vm419_vm0, %v1401_v30 }
  0xaf   : > { %v383_v35 = vpop.permute.xlu1 %382  ;;  %v359_v36 = vpop.permute.xlu0 %358  ;;  %1672 = vmatprep.mubr.f32.mxu1 %v4464_v24 }
  0xb0   : > { %v402_v40 = vsel %vm394_vm1, %v359_v36, %v383_v35  ;;  %v414_v41 = vsel %vm394_vm1, %v383_v35, %v359_v36  ;;  %1433 = vperm.xlu0 %2643, %v2572_v14  }
  0xb1   : > { %484 = vmatprep.subr.mxu0 %v402_v40  ;;  %1438 = vperm.xlu1 %2644, %v2573_v13   ;;  %v2582_v40 = vld [vmem:[%s4460_s2 + $0xd8] sm:$0xff] }
  0xb2   : > { %485 = vmatpush1.msra.mxu0 %v414_v41  ;;  %2596 = vmatmul.mubr.msk.f32.gmra.mxu1 %vm419_vm0, %v1402_v37  ;;  %v330_v37 = vld [vmem:[%s4459_s1 + $0x10] sm:$0xff] }
  0xb3   : > { %v381_v42 = vpop.permute.xlu1 %380  ;;  %v357_v43 = vpop.permute.xlu0 %356  ;;  %1678 = vmatprep.mubr.f32.mxu1 %v4464_v24 }
  0xb4   : > { %v401_v47 = vsel %vm394_vm1, %v357_v43, %v381_v42  ;;  %v413_v48 = vsel %vm394_vm1, %v381_v42, %v357_v43  ;;  %1443 = vperm.xlu0 %2643, %v2574_v20   ;;  %v331_v43 = vld [vmem:[%s4459_s1 + $0x18] sm:$0xff] }
  0xb5   : > { %486 = vmatprep.subr.mxu0 %v401_v47  ;;  %1448 = vperm.xlu1 %2644, %v2575_v19  }
  0xb6   : > { %487 = vmatpush1.msra.mxu0 %v413_v48  ;;  %2597 = vmatmul.mubr.msk.f32.gmra.mxu1 %vm419_vm0, %v1403_v44 }
  0xb7   : > { %v379_v49 = vpop.permute.xlu1 %378  ;;  %v355_v50 = vpop.permute.xlu0 %354  ;;  %1684 = vmatprep.mubr.f32.mxu1 %v4464_v24 }
  0xb8   : > { %v400_v54 = vsel %vm394_vm1, %v355_v50, %v379_v49  ;;  %v412_v55 = vsel %vm394_vm1, %v379_v49, %v355_v50  ;;  %1453 = vperm.xlu0 %2643, %v2576_v26   ;;  %v332_v49 = vld [vmem:[%s4459_s1 + $0x20] sm:$0xff] }
  0xb9   : > { %488 = vmatprep.subr.mxu0 %v400_v54  ;;  %1458 = vperm.xlu1 %2644, %v2577_v25   ;;  %v333_v54 = vld [vmem:[%s4459_s1 + $0x28] sm:$0xff] }
  0xba   : > { %489 = vmatpush1.msra.mxu0 %v412_v55  ;;  %2598 = vmatmul.mubr.msk.f32.gmra.mxu1 %vm419_vm0, %v1404_v51 }
  0xbb   : > { %v377_v56 = vpop.permute.xlu1 %376  ;;  %v353_v57 = vpop.permute.xlu0 %352  ;;  %1690 = vmatprep.mubr.f32.mxu1 %v4464_v24 }
  0xbc   : > { %v399_v60 = vsel %vm394_vm1, %v353_v57, %v377_v56  ;;  %v411_v61 = vsel %vm394_vm1, %v377_v56, %v353_v57  ;;  %1468 = vperm.xlu0 %2643, %v2579_v33   ;;  %v2540_v33 = vld [vmem:[%s4459_s1 + $0x88] sm:$0xff] }
  0xbd   : > { %490 = vmatprep.subr.mxu0 %v399_v60  ;;  %1463 = vperm.xlu1 %2644, %v2578_v32   ;;  %v2539_v32 = vld [vmem:[%s4459_s1 + $0x80] sm:$0xff] }
  0xbe   : > { %491 = vmatpush1.msra.mxu0 %v411_v61 }
  0xbf   : > { %v375_v62 = vpop.permute.xlu1 %374  ;;  %v351_v63 = vpop.permute.xlu0 %350 }
  0xc0   : > { %v398_v2 = vsel %vm394_vm1, %v351_v63, %v375_v62  ;;  %v410_v3 = vsel %vm394_vm1, %v375_v62, %v351_v63  ;;  %1483 = vperm.xlu0 %2643, %v2582_v40   ;;  %v2547_v40 = vld [vmem:[%s4459_s1 + $0xc0] sm:$0xff] }
  0xc1   : > { %492 = vmatprep.subr.mxu0 %v398_v2  ;;  %1473 = vperm.xlu1 %2644, %v2580_v39   ;;  %v2546_v39 = vld [vmem:[%s4459_s1 + $0xb8] sm:$0xff] }
  0xc2   : > { %493 = vmatpush1.msra.mxu0 %v410_v3 }
  0xc3   : > { %v373_v4 = vpop.permute.xlu1 %372  ;;  %v349_v5 = vpop.permute.xlu0 %348 }
  0xc4   : > { %v397_v9 = vsel %vm394_vm1, %v349_v5, %v373_v4  ;;  %v409_v10 = vsel %vm394_vm1, %v373_v4, %v349_v5  ;;  %v336_v5 = vld [vmem:[%s4459_s1 + $0x40] sm:$0xff] }
  0xc5   : > { %494 = vmatprep.subr.mxu0 %v397_v9  ;;  %1478 = vperm.xlu1 %2644, %v2581_v46   ;;  %v2553_v46 = vld [vmem:[%s4459_s1 + $0xf0] sm:$0xff] }
  0xc6   : > { %495 = vmatpush1.msra.mxu0 %v409_v10 }
  0xc7   : > { %v371_v11 = vpop.permute.xlu1 %370  ;;  %v347_v12 = vpop.permute.xlu0 %346 }
  0xc8   : > { %v396_v15 = vsel %vm394_vm1, %v347_v12, %v371_v11  ;;  %v408_v16 = vsel %vm394_vm1, %v371_v11, %v347_v12  ;;  %v337_v11 = vld [vmem:[%s4459_s1 + $0x48] sm:$0xff] }
  0xc9   : > { %496 = vmatprep.subr.mxu0 %v396_v15 }
  0xca   : > { %497 = vmatpush1.msra.mxu0 %v408_v16  ;;  %v338_v16 = vld [vmem:[%s4459_s1 + $0x50] sm:$0xff] }
  0xcb   : > { %v369_v17 = vpop.permute.xlu1 %368  ;;  %v345_v18 = vpop.permute.xlu0 %344 }
  0xcc   : > { %v395_v21 = vsel %vm394_vm1, %v345_v18, %v369_v17  ;;  %v407_v22 = vsel %vm394_vm1, %v369_v17, %v345_v18 }
  0xcd   : > { %498 = vmatprep.subr.mxu0 %v395_v21  ;;  %v339_v21 = vld [vmem:[%s4459_s1 + $0x58] sm:$0xff] }
  0xce   : > { %499 = vmatpush1.msra.mxu0 %v407_v22 }
  0xcf   : > { %v902_v27 = vpop.permute.xlu1 %901  ;;  %2507 = vmatmul.mubr.msk.f32.vlgmr.msra.gmra.mxu0 %vm419_vm0, %v328_v23  ;;  %v878_v28 = vpop.permute.xlu0 %877 }
  0xd0   : > { %v915_v29 = vsel %vm903_vm2, %v878_v28, %v902_v27  ;;  %538 = vmatprep.mubr.f32.mxu0 %v4464_v24  ;;  %v927_v30 = vsel %vm903_vm2, %v902_v27, %v878_v28  ;;  %v340_v27 = vld [vmem:[%s4459_s1 + $0x60] sm:$0xff] }
  0xd1   : > { %984 = vmatprep.subr.mxu0 %v915_v29 }
  0xd2   : > { %985 = vmatpush1.msra.mxu0 %v927_v30  ;;  %v341_v30 = vld [vmem:[%s4459_s1 + $0x68] sm:$0xff] }
  0xd3   : > { %2508 = vmatmul.mubr.msk.f32.gmra.mxu0 %vm419_vm0, %v329_v31  ;;  %v900_v34 = vpop.permute.xlu1 %899  ;;  %v876_v35 = vpop.permute.xlu0 %875  ;;  %v342_v31 = vld [vmem:[%s4459_s1 + $0x70] sm:$0xff] }
  0xd4   : > { %544 = vmatprep.mubr.f32.mxu0 %v4464_v24  ;;  %v914_v36 = vsel %vm903_vm2, %v876_v35, %v900_v34  ;;  %v926_v38 = vsel %vm903_vm2, %v900_v34, %v876_v35  ;;  %v2541_v34 = vld [vmem:[%s4459_s1 + $0x90] sm:$0xff]  ;;  %v2542_v35 = vld [vmem:[%s4459_s1 + $0x98] sm:$0xff] }
  0xd5   : > { %986 = vmatprep.subr.mxu0 %v914_v36  ;;  %v2543_v36 = vld [vmem:[%s4459_s1 + $0xa0] sm:$0xff] }
  0xd6   : > { %987 = vmatpush1.msra.mxu0 %v926_v38  ;;  %v2545_v38 = vld [vmem:[%s4459_s1 + $0xb0] sm:$0xff] }
  0xd7   : > { %2509 = vmatmul.mubr.msk.f32.gmra.mxu0 %vm419_vm0, %v330_v37  ;;  %v898_v41 = vpop.permute.xlu1 %897  ;;  %v874_v42 = vpop.permute.xlu0 %873  ;;  %v2544_v37 = vld [vmem:[%s4459_s1 + $0xa8] sm:$0xff] }
  0xd8   : > { %550 = vmatprep.mubr.f32.mxu0 %v4464_v24  ;;  %v913_v44 = vsel %vm903_vm2, %v874_v42, %v898_v41  ;;  %v925_v45 = vsel %vm903_vm2, %v898_v41, %v874_v42  ;;  %v2548_v41 = vld [vmem:[%s4459_s1 + $0xc8] sm:$0xff]  ;;  %v2549_v42 = vld [vmem:[%s4459_s1 + $0xd0] sm:$0xff] }
  0xd9   : > { %988 = vmatprep.subr.mxu0 %v913_v44  ;;  %v2551_v44 = vld [vmem:[%s4459_s1 + $0xe0] sm:$0xff] }
  0xda   : > { %989 = vmatpush1.msra.mxu0 %v925_v45  ;;  %v2552_v45 = vld [vmem:[%s4459_s1 + $0xe8] sm:$0xff] }
  0xdb   : > { %2510 = vmatmul.mubr.msk.f32.gmra.mxu0 %vm419_vm0, %v331_v43  ;;  %v896_v47 = vpop.permute.xlu1 %895  ;;  %v872_v48 = vpop.permute.xlu0 %871  ;;  %v2550_v43 = vld [vmem:[%s4459_s1 + $0xd8] sm:$0xff] }
  0xdc   : > { %556 = vmatprep.mubr.f32.mxu0 %v4464_v24  ;;  %v912_v50 = vsel %vm903_vm2, %v872_v48, %v896_v47  ;;  %v924_v51 = vsel %vm903_vm2, %v896_v47, %v872_v48  ;;  %v2554_v47 = vld [vmem:[%s4459_s1 + $0xf8] sm:$0xff]  ;;  %v1405_v48 = vld [vmem:[%s4462_s4 + $0x60] sm:$0xff] }
  0xdd   : > { %990 = vmatprep.subr.mxu0 %v912_v50  ;;  %2599 = vmatmul.mubr.msk.f32.gmra.mxu1 %vm419_vm0, %v1405_v48 }
  0xde   : > { %991 = vmatpush1.msra.mxu0 %v924_v51  ;;  %1696 = vmatprep.mubr.f32.mxu1 %v4464_v24 }
  0xdf   : > { %2511 = vmatmul.mubr.msk.f32.gmra.mxu0 %vm419_vm0, %v332_v49  ;;  %v894_v52 = vpop.permute.xlu1 %893  ;;  %v870_v53 = vpop.permute.xlu0 %869  ;;  %v1406_v49 = vld [vmem:[%s4462_s4 + $0x68] sm:$0xff] }
  0xe0   : > { %562 = vmatprep.mubr.f32.mxu0 %v4464_v24  ;;  %v911_v55 = vsel %vm903_vm2, %v870_v53, %v894_v52  ;;  %v923_v56 = vsel %vm903_vm2, %v894_v52, %v870_v53 }
  0xe1   : > { %992 = vmatprep.subr.mxu0 %v911_v55  ;;  %2600 = vmatmul.mubr.msk.f32.gmra.mxu1 %vm419_vm0, %v1406_v49 }
  0xe2   : > { %993 = vmatpush1.msra.mxu0 %v923_v56  ;;  %1702 = vmatprep.mubr.f32.mxu1 %v4464_v24 }
  0xe3   : > { %2512 = vmatmul.mubr.msk.f32.gmra.mxu0 %vm419_vm0, %v333_v54  ;;  %v892_v57 = vpop.permute.xlu1 %891  ;;  %v868_v58 = vpop.permute.xlu0 %867 }
  0xe4   : > { %568 = vmatprep.mubr.f32.mxu0 %v4464_v24  ;;  %v910_v60 = vsel %vm903_vm2, %v868_v58, %v892_v57  ;;  %v922_v61 = vsel %vm903_vm2, %v892_v57, %v868_v58 }
  0xe5   : > { %994 = vmatprep.subr.mxu0 %v910_v60 }
  0xe6   : > { %995 = vmatpush1.msra.mxu0 %v922_v61 }
  0xe7   : > { %2513 = vmatmul.mubr.msk.f32.gmra.mxu0 %vm419_vm0, %v334_v59  ;;  %v890_v62 = vpop.permute.xlu1 %889  ;;  %v866_v63 = vpop.permute.xlu0 %865 }
  0xe8   : > { %574 = vmatprep.mubr.f32.mxu0 %v4464_v24  ;;  %v909_v1 = vsel %vm903_vm2, %v866_v63, %v890_v62  ;;  %v921_v2 = vsel %vm903_vm2, %v890_v62, %v866_v63 }
  0xe9   : > { %996 = vmatprep.subr.mxu0 %v909_v1 }
  0xea   : > { %997 = vmatpush1.msra.mxu0 %v921_v2 }
  0xeb   : > { %2514 = vmatmul.mubr.msk.f32.gmra.mxu0 %vm419_vm0, %v335_v0  ;;  %v888_v3 = vpop.permute.xlu1 %887  ;;  %v864_v4 = vpop.permute.xlu0 %863 }
  0xec   : > { %580 = vmatprep.mubr.f32.mxu0 %v4464_v24  ;;  %v908_v6 = vsel %vm903_vm2, %v864_v4, %v888_v3  ;;  %v920_v8 = vsel %vm903_vm2, %v888_v3, %v864_v4 }
  0xed   : > { %998 = vmatprep.subr.mxu0 %v908_v6 }
  0xee   : > { %999 = vmatpush1.msra.mxu0 %v920_v8 }
  0xef   : > { %2515 = vmatmul.mubr.msk.f32.gmra.mxu0 %vm419_vm0, %v336_v5  ;;  %v886_v9 = vpop.permute.xlu1 %885  ;;  %v862_v10 = vpop.permute.xlu0 %861 }
  0xf0   : > { %586 = vmatprep.mubr.f32.mxu0 %v4464_v24  ;;  %v907_v12 = vsel %vm903_vm2, %v862_v10, %v886_v9  ;;  %v919_v13 = vsel %vm903_vm2, %v886_v9, %v862_v10 }
  0xf1   : > { %1000 = vmatprep.subr.mxu0 %v907_v12 }
  0xf2   : > { %1001 = vmatpush1.msra.mxu0 %v919_v13 }
  0xf3   : > { %2516 = vmatmul.mubr.msk.f32.gmra.mxu0 %vm419_vm0, %v337_v11  ;;  %v884_v14 = vpop.permute.xlu1 %883  ;;  %v860_v15 = vpop.permute.xlu0 %859 }
  0xf4   : > { %592 = vmatprep.mubr.f32.mxu0 %v4464_v24  ;;  %v906_v17 = vsel %vm903_vm2, %v860_v15, %v884_v14  ;;  %v918_v18 = vsel %vm903_vm2, %v884_v14, %v860_v15 }
  0xf5   : > { %1002 = vmatprep.subr.mxu0 %v906_v17 }
  0xf6   : > { %1003 = vmatpush1.msra.mxu0 %v918_v18 }
  0xf7   : > { %2517 = vmatmul.mubr.msk.f32.gmra.mxu0 %vm419_vm0, %v338_v16  ;;  %v882_v19 = vpop.permute.xlu1 %881  ;;  %v858_v20 = vpop.permute.xlu0 %857 }
  0xf8   : > { %598 = vmatprep.mubr.f32.mxu0 %v4464_v24  ;;  %v905_v22 = vsel %vm903_vm2, %v858_v20, %v882_v19  ;;  %v917_v23 = vsel %vm903_vm2, %v882_v19, %v858_v20 }
  0xf9   : > { %1004 = vmatprep.subr.mxu0 %v905_v22 }
  0xfa   : > { %1005 = vmatpush1.msra.mxu0 %v917_v23 }
  0xfb   : > { %2518 = vmatmul.mubr.msk.f32.gmra.mxu0 %vm419_vm0, %v339_v21  ;;  %v880_v25 = vpop.permute.xlu1 %879  ;;  %v856_v26 = vpop.permute.xlu0 %855 }
  0xfc   : > { %604 = vmatprep.mubr.f32.mxu0 %v4464_v24  ;;  %v916_v28 = vsel %vm903_vm2, %v880_v25, %v856_v26  ;;  %v904_v29 = vsel %vm903_vm2, %v856_v26, %v880_v25 }
  0xfd   : > { %1006 = vmatprep.subr.mxu0 %v904_v29 }
  0xfe   : > { %1007 = vmatpush1.msra.mxu0 %v916_v28 }
  0xff   : > { %2519 = vmatmul.mubr.msk.f32.gmra.mxu0 %vm419_vm0, %v340_v27 }
 0x100   : > { %610 = vmatprep.mubr.f32.mxu0 %v4464_v24 }
 0x103   : > { %2520 = vmatmul.mubr.msk.f32.gmra.mxu0 %vm419_vm0, %v341_v30 }
 0x104   : > { %616 = vmatprep.mubr.f32.mxu0 %v4464_v24 }
 0x107   : > { %2521 = vmatmul.mubr.msk.f32.gmra.mxu0 %vm419_vm0, %v342_v31 }
 0x108   : > { %622 = vmatprep.mubr.f32.mxu0 %v4464_v24 }
 0x10b   : > { %2522 = vmatmul.mubr.msk.f32.gmra.mxu0 %vm419_vm0, %v343_v7 }
 0x10c   : > { %1040 = vmatprep.mubr.f32.mxu0 %v4464_v24 }
 0x10e   : > { %v743_v50 = vpop.f32.mrf.mxu1 }
 0x10f   : > { %2555 = vmatmul.mubr.msk.f32.vlgmr.msra.gmra.mxu0 %vm419_vm0, %v2539_v32 }
 0x110   : > { %1046 = vmatprep.mubr.f32.mxu0 %v4464_v24  ;;  %v745_v53 = vpop.f32.mrf.mxu1 }
 0x112   : > { %v749_v56 = vpop.f32.mrf.mxu1 }
 0x113   : > { %2556 = vmatmul.mubr.msk.f32.gmra.mxu0 %vm419_vm0, %v2540_v33 }
 0x114   : > { %1052 = vmatprep.mubr.f32.mxu0 %v4464_v24  ;;  %v751_v59 = vpop.f32.mrf.mxu1 }
 0x116   : > { %v755_v62 = vpop.f32.mrf.mxu1 }
 0x117   : > { %2557 = vmatmul.mubr.msk.f32.gmra.mxu0 %vm419_vm0, %v2541_v34 }
 0x118   : > { %1058 = vmatprep.mubr.f32.mxu0 %v4464_v24  ;;  %v757_v1 = vpop.f32.mrf.mxu1 }
 0x11a   : > { %v3592_v4 = vpop.f32.mrf.mxu1 }
 0x11b   : > { %2558 = vmatmul.mubr.msk.f32.gmra.mxu0 %vm419_vm0, %v2542_v35 }
 0x11c   : > { %1064 = vmatprep.mubr.f32.mxu0 %v4464_v24  ;;  %v3598_v8 = vpop.f32.mrf.mxu1 }
 0x11e   : > { %v3604_v11 = vpop.f32.mrf.mxu1 }
 0x11f   : > { %2559 = vmatmul.mubr.msk.f32.gmra.mxu0 %vm419_vm0, %v2543_v36 }
 0x120   : > { %1070 = vmatprep.mubr.f32.mxu0 %v4464_v24  ;;  %v3610_v14 = vpop.f32.mrf.mxu1 }
 0x122   : > { %v3616_v17 = vpop.f32.mrf.mxu1 }
 0x123   : > { %2560 = vmatmul.mubr.msk.f32.gmra.mxu0 %vm419_vm0, %v2544_v37 }
 0x124   : > { %1076 = vmatprep.mubr.f32.mxu0 %v4464_v24  ;;  %v3622_v20 = vpop.f32.mrf.mxu1 }
 0x126   : > { %v3628_v23 = vpop.f32.mrf.mxu1 }
 0x127   : > { %2561 = vmatmul.mubr.msk.f32.gmra.mxu0 %vm419_vm0, %v2545_v38 }
 0x128   : > { %1082 = vmatprep.mubr.f32.mxu0 %v4464_v24  ;;  %v3634_v27 = vpop.f32.mrf.mxu1 }
 0x12a   : > { %v3640_v30 = vpop.f32.mrf.mxu1 }
 0x12b   : > { %2562 = vmatmul.mubr.msk.f32.gmra.mxu0 %vm419_vm0, %v2546_v39 }
 0x12c   : > { %1088 = vmatprep.mubr.f32.mxu0 %v4464_v24  ;;  %v3646_v32 = vpop.f32.mrf.mxu1 }
 0x12e   : > { %v3652_v35 = vpop.f32.mrf.mxu1 }
 0x12f   : > { %2563 = vmatmul.mubr.msk.f32.gmra.mxu0 %vm419_vm0, %v2547_v40  ;;  %v1188_v40 = vpop.permute.xlu0 %1187 }
 0x130   : > { %1094 = vmatprep.mubr.f32.mxu0 %v4464_v24 }
 0x133   : > { %2564 = vmatmul.mubr.msk.f32.gmra.mxu0 %vm419_vm0, %v2548_v41 }
 0x134   : > { %1100 = vmatprep.mubr.f32.mxu0 %v4464_v24 }
 0x137   : > { %2565 = vmatmul.mubr.msk.f32.gmra.mxu0 %vm419_vm0, %v2549_v42  ;;  %v3654_v42 = vpop.f32.mrf.mxu1 }
 0x138   : > { %1106 = vmatprep.mubr.f32.mxu0 %v4464_v24 }
 0x13b   : > { %2566 = vmatmul.mubr.msk.f32.gmra.mxu0 %vm419_vm0, %v2550_v43 }
 0x13c   : > { %1112 = vmatprep.mubr.f32.mxu0 %v4464_v24 }
 0x13f   : > { %2567 = vmatmul.mubr.msk.f32.gmra.mxu0 %vm419_vm0, %v2551_v44 }
 0x140   : > { %1118 = vmatprep.mubr.f32.mxu0 %v4464_v24 }
 0x143   : > { %2568 = vmatmul.mubr.msk.f32.gmra.mxu0 %vm419_vm0, %v2552_v45 }
 0x144   : > { %1124 = vmatprep.mubr.f32.mxu0 %v4464_v24 }
 0x147   : > { %2569 = vmatmul.mubr.msk.f32.gmra.mxu0 %vm419_vm0, %v2553_v46 }
 0x148   : > { %1130 = vmatprep.mubr.f32.mxu0 %v4464_v24 }
 0x14b   : > { %2570 = vmatmul.mubr.msk.f32.gmra.mxu0 %vm419_vm0, %v2554_v47  ;;  %v1193_v47 = vpop.permute.xlu1 %1192 }
 0x18f   : > { %v534_v51 = vpop.f32.mrf.mxu0 }
 0x190   : > { %v744_v36 = vadd.f32 %v743_v50, %v534_v51  ;;  %v3659_v50 = vld [vmem:[%s4461_s3 + $0x2] ss:$0 sm:$0xff] }
 0x191   : > { %v536_v52 = vpop.f32.mrf.mxu0 }
 0x192   : > { %v746_v38 = vadd.f32 %v745_v53, %v536_v52  ;;  %v3661_v53 = vpop.f32.mrf.mxu1 }
 0x193   : > { %v540_v54 = vpop.f32.mrf.mxu0 }
 0x194   : > { %v750_v43 = vadd.f32 %v749_v56, %v540_v54 }
 0x195   : > { %v542_v55 = vpop.f32.mrf.mxu0 }
 0x196   : > { %v752_v46 = vadd.f32 %v751_v59, %v542_v55 }
 0x197   : > { %v546_v57 = vpop.f32.mrf.mxu0 }
 0x198   : > { %v756_v51 = vadd.f32 %v755_v62, %v546_v57  ;;  %v1198_v62 = vpop.permute.xlu1 %1197 }
 0x199   : > { %v3578_v58 = vpop.f32.mrf.mxu0 }
 0x19a   : > { %v758_v55 = vadd.f32 %v757_v1, %v3578_v58 }
 0x19b   : > { %v3580_v60 = vpop.f32.mrf.mxu0 }
 0x19c   : > { %v762_v57 = vadd.f32 %v3592_v4, %v3580_v60 }
 0x19d   : > { %v3582_v61 = vpop.f32.mrf.mxu0 }
 0x19f   : > { %v3584_v63 = vpop.f32.mrf.mxu0 }
 0x1a1   : > { %v3586_v0 = vpop.f32.mrf.mxu0 }
 0x1a3   : > { %v3588_v2 = vpop.f32.mrf.mxu0 }
 0x1a5   : > { %v3590_v3 = vpop.f32.mrf.mxu0 }
 0x1a7   : > { %v3594_v5 = vpop.f32.mrf.mxu0 }
 0x1a9   : > { %v3596_v6 = vpop.f32.mrf.mxu0 }
 0x1ab   : > { %v3600_v9 = vpop.f32.mrf.mxu0 }
 0x1ad   : > { %v3602_v10 = vpop.f32.mrf.mxu0 }
 0x1af   : > { %v3606_v12 = vpop.f32.mrf.mxu0 }
 0x1b1   : > { %v3608_v13 = vpop.f32.mrf.mxu0 }
 0x1b3   : > { %v3612_v15 = vpop.f32.mrf.mxu0 }
 0x1b5   : > { %v3614_v16 = vpop.f32.mrf.mxu0 }
 0x1b7   : > { %v3618_v18 = vpop.f32.mrf.mxu0 }
 0x1b9   : > { %v3620_v19 = vpop.f32.mrf.mxu0 }
 0x1bb   : > { %v3624_v21 = vpop.f32.mrf.mxu0 }
 0x1bd   : > { %v3626_v22 = vpop.f32.mrf.mxu0 }
 0x1bf   : > { %v3630_v25 = vpop.f32.mrf.mxu0 }
 0x1c1   : > { %v3632_v26 = vpop.f32.mrf.mxu0 }
 0x1c3   : > { %v3636_v28 = vpop.f32.mrf.mxu0 }
 0x1c5   : > { %v3638_v29 = vpop.f32.mrf.mxu0 }
 0x1c7   : > { %v3642_v31 = vpop.f32.mrf.mxu0 }
 0x1c9   : > { %v3644_v7 = vpop.f32.mrf.mxu0 }
 0x1cb   : > { %v3648_v33 = vpop.f32.mrf.mxu0 }
 0x1cd   : > { %v3650_v34 = vpop.f32.mrf.mxu0 }
 0x1ce   : > { %4478 = vst [vmem:[#allocation4_spill] sm:$0xff] %v3650_v34 }
 0x1cf   : > { %v1042_v37 = vpop.f32.mrf.mxu0 }
 0x1d0   : > { %v1137_v39 = vadd.f32 %v1042_v37, %v744_v36 }
 0x1d1   : > { %v1044_v41 = vpop.f32.mrf.mxu0 }
 0x1d2   : > { %v1265_v44 = vadd.f32 %v1188_v40, %v1137_v39  ;;  %v1138_v45 = vadd.f32 %v1044_v41, %v746_v38 }
 0x1d3   : > { %v1048_v48 = vpop.f32.mrf.mxu0 }
 0x1d4   : > { %v1266_v49 = vadd.f32 %v1188_v40, %v1138_v45  ;;  %v1139_v24 = vadd.f32 %v1048_v48, %v750_v43  ;;  %vm1297_vm3 = vcmp.gt.f32.partialorder %v1265_v44, 0.0  ;;  %v1329_v34 = vmul.f32 0.01, %v1265_v44  ;;  %v3672_v43 = vpop.f32.mrf.mxu1 }
 0x1d5   : > { %v1050_v52 = vpop.f32.mrf.mxu0 }
 0x1d6   : > { %v1267_v36 = vadd.f32 %v1193_v47, %v1139_v24  ;;  %v1140_v54 = vadd.f32 %v1050_v52, %v752_v46  ;;  %v3663_v56 = vsel %vm1297_vm3, %v1265_v44, %v1329_v34  ;;  %vm1298_vm4 = vcmp.gt.f32.partialorder %v1266_v49, 0.0  ;;  %v1203_v52 = vpop.permute.xlu0 %1202 }
 0x1d7   : > { %v1054_v59 = vpop.f32.mrf.mxu0  ;;  %v1722_v37 = vmul.f32 %v3659_v50, %v3663_v56  ;;  %v1330_v38 = vmul.f32 0.01, %v1266_v49  ;;  %v764_v46 = vadd.f32 %v3598_v8, %v3582_v61 }
 0x1d8   : > { %v1268_v39 = vadd.f32 %v1193_v47, %v1140_v54  ;;  %v1141_v40 = vadd.f32 %v1054_v59, %v756_v51  ;;  %vm1299_vm5 = vcmp.gt.f32.partialorder %v1267_v36, 0.0  ;;  %v1331_v41 = vmul.f32 0.01, %v1267_v36  ;;  %v3686_v59 = vpop.f32.mrf.mxu1 }
 0x1d9   : > { %v1056_v24 = vpop.f32.mrf.mxu0  ;;  %1738 = vadd.xlane.f32.xlu0 %v1722_v37  ;;  %v3670_v34 = vsel %vm1298_vm4, %v1266_v49, %v1330_v38  ;;  %v768_v51 = vadd.f32 %v3604_v11, %v3584_v63  ;;  %v770_v63 = vadd.f32 %v3610_v14, %v3586_v0 }
 0x1da   : > { %v1269_v58 = vadd.f32 %v1198_v62, %v1141_v40  ;;  %v1142_v1 = vadd.f32 %v1056_v24, %v758_v55  ;;  %v2034_v44 = vmul.f32 %v3659_v50, %v3670_v34  ;;  %v3676_v45 = vsel %vm1299_vm5, %v1267_v36, %v1331_v41 }
 0x1db   : > { %v1060_v47 = vpop.f32.mrf.mxu0  ;;  %vm1300_vm6 = vcmp.gt.f32.partialorder %v1268_v39, 0.0  ;;  %v1332_v60 = vmul.f32 0.01, %v1268_v39  ;;  %v1723_v36 = vmul.f32 %v3659_v50, %v3676_v45 }
 0x1dc   : > { %v1270_v4 = vadd.f32 %v1198_v62, %v1142_v1  ;;  %v1143_v48 = vadd.f32 %v1060_v47, %v762_v57  ;;  %2050 = vadd.xlane.f32.xlu1 %v2034_v44  ;;  %vm1301_vm7 = vcmp.gt.f32.partialorder %v1269_v58, 0.0  ;;  %v1333_v49 = vmul.f32 0.01, %v1269_v58  ;;  %v1208_v62 = vpop.permute.xlu1 %1207 }
 0x1dd   : > { %v1062_v54 = vpop.f32.mrf.mxu0  ;;  %v3684_v55 = vsel %vm1300_vm6, %v1268_v39, %v1332_v60  ;;  %v774_v39 = vadd.f32 %v3616_v17, %v3588_v2  ;;  %v776_v60 = vadd.f32 %v3622_v20, %v3590_v3 }
 0x1de   : > { %v1271_v61 = vadd.f32 %v1203_v52, %v1143_v48  ;;  %v1144_v8 = vadd.f32 %v1062_v54, %v764_v46  ;;  %v2035_v37 = vmul.f32 %v3659_v50, %v3684_v55  ;;  %vm1302_vm8 = vcmp.gt.f32.partialorder %v1270_v4, 0.0  ;;  %v3698_v46 = vpop.f32.mrf.mxu1 }
 0x1df   : > { %v1066_v38 = vpop.f32.mrf.mxu0  ;;  %v1334_v40 = vmul.f32 0.01, %v1270_v4  ;;  %v3690_v41 = vsel %vm1301_vm7, %v1269_v58, %v1333_v49 }
 0x1e0   : > { %v1272_v11 = vadd.f32 %v1203_v52, %v1144_v8  ;;  %v1145_v57 = vadd.f32 %v1066_v38, %v768_v51  ;;  %1740 = vadd.xlane.f32.xlu1 %v1723_v36  ;;  %2052 = vadd.xlane.f32.xlu0 %v2035_v37  ;;  %vm1303_vm9 = vcmp.gt.f32.partialorder %v1271_v61, 0.0  ;;  %v1335_v44 = vmul.f32 0.01, %v1271_v61  ;;  %v1213_v52 = vpop.permute.xlu0 %1212  ;;  %v3710_v8 = vpop.f32.mrf.mxu1 }
 0x1e1   : > { %v1068_v24 = vpop.f32.mrf.mxu0  ;;  %v3696_v1 = vsel %vm1302_vm8, %v1270_v4, %v1334_v40  ;;  %v1724_v14 = vmul.f32 %v3659_v50, %v3690_v41  ;;  %v780_v51 = vadd.f32 %v3628_v23, %v3594_v5 }
 0x1e2   : > { %v1273_v58 = vadd.f32 %v1208_v62, %v1145_v57  ;;  %v1146_v47 = vadd.f32 %v1068_v24, %v770_v63  ;;  %v2036_v0 = vmul.f32 %v3659_v50, %v3696_v1  ;;  %v3706_v2 = vsel %vm1303_vm9, %v1271_v61, %v1335_v44 }
 0x1e3   : > { %v1072_v48 = vpop.f32.mrf.mxu0  ;;  %v1336_v17 = vmul.f32 0.01, %v1272_v11  ;;  %vm1304_vm11 = vcmp.gt.f32.partialorder %v1272_v11, 0.0  ;;  %v1725_v20 = vmul.f32 %v3659_v50, %v3706_v2  ;;  %v782_v61 = vadd.f32 %v3634_v27, %v3596_v6 }
 0x1e4   : > { %v1274_v4 = vadd.f32 %v1208_v62, %v1146_v47  ;;  %v1147_v49 = vadd.f32 %v1072_v48, %v774_v39  ;;  %2054 = vadd.xlane.f32.xlu1 %v2036_v0  ;;  %1742 = vadd.xlane.f32.xlu0 %v1724_v14  ;;  %vm1305_vm10 = vcmp.gt.f32.partialorder %v1273_v58, 0.0  ;;  %v1337_v36 = vmul.f32 0.01, %v1273_v58  ;;  %v1218_v62 = vpop.permute.xlu1 %1217  ;;  %v3724_v0 = vpop.f32.mrf.mxu1 }
 0x1e5   : > { %v1074_v54 = vpop.f32.mrf.mxu0  ;;  %v3718_v63 = vsel %vm1304_vm11, %v1272_v11, %v1336_v17  ;;  %v786_v6 = vadd.f32 %v3640_v30, %v3600_v9  ;;  %v788_v14 = vadd.f32 %v3646_v32, %v3602_v10  ;;  %v792_v9 = vadd.f32 %v3652_v35, %v3606_v12  ;;  %v1223_v30 = vpop.permute.xlu0 %1222 }
 0x1e6   : > { %v1275_v37 = vadd.f32 %v1213_v52, %v1147_v49  ;;  %v1148_v3 = vadd.f32 %v1074_v54, %v776_v60  ;;  %vm1306_vm12 = vcmp.gt.f32.partialorder %v1274_v4, 0.0  ;;  %v3716_v40 = vsel %vm1305_vm10, %v1273_v58, %v1337_v36  ;;  %v3738_v36 = vpop.f32.mrf.mxu1 }
 0x1e7   : > { %v1078_v38 = vpop.f32.mrf.mxu0  ;;  %v1338_v5 = vmul.f32 0.01, %v1274_v4  ;;  %v1726_v39 = vmul.f32 %v3659_v50, %v3716_v40  ;;  %v2037_v58 = vmul.f32 %v3659_v50, %v3718_v63 }
 0x1e8   : > { %v1276_v23 = vadd.f32 %v1213_v52, %v1148_v3  ;;  %v1149_v57 = vadd.f32 %v1078_v38, %v780_v51  ;;  %1744 = vadd.xlane.f32.xlu0 %v1725_v20  ;;  %vm1307_vm13 = vcmp.gt.f32.partialorder %v1275_v37, 0.0  ;;  %v1339_v47 = vmul.f32 0.01, %v1275_v37 }
 0x1e9   : > { %v1080_v24 = vpop.f32.mrf.mxu0  ;;  %v3722_v44 = vsel %vm1306_vm12, %v1274_v4, %v1338_v5  ;;  %1746 = vadd.xlane.f32.xlu1 %v1726_v39  ;;  %v794_v3 = vadd.f32 %v3654_v42, %v3608_v13  ;;  %v1228_v39 = vpop.permute.xlu1 %1227  ;;  %v798_v13 = vadd.f32 %v3661_v53, %v3612_v15  ;;  %v804_v53 = vadd.f32 %v3686_v59, %v3618_v18 }
 0x1ea   : > { %v1277_v27 = vadd.f32 %v1218_v62, %v1149_v57  ;;  %v1150_v11 = vadd.f32 %v1080_v24, %v782_v61  ;;  %v2038_v48 = vmul.f32 %v3659_v50, %v3722_v44  ;;  %v3734_v17 = vsel %vm1307_vm13, %v1275_v37, %v1339_v47  ;;  %v1233_v15 = vpop.permute.xlu0 %1232 }
 0x1eb   : > { %v1084_v60 = vpop.f32.mrf.mxu0  ;;  %v1340_v4 = vmul.f32 0.01, %v1276_v23  ;;  %vm1308_vm15 = vcmp.gt.f32.partialorder %v1276_v23, 0.0  ;;  %v1727_v37 = vmul.f32 %v3659_v50, %v3734_v17 }
 0x1ec   : > { %v1278_v49 = vadd.f32 %v1218_v62, %v1150_v11  ;;  %v1151_v51 = vadd.f32 %v1084_v60, %v786_v6  ;;  %2056 = vadd.xlane.f32.xlu0 %v2037_v58  ;;  %vm1309_vm14 = vcmp.gt.f32.partialorder %v1277_v27, 0.0  ;;  %v1341_v54 = vmul.f32 0.01, %v1277_v27  ;;  %v3752_v6 = vpop.f32.mrf.mxu1 }
 0x1ed   : > { %v1086_v52 = vpop.f32.mrf.mxu0  ;;  %2058 = vadd.xlane.f32.xlu1 %v2038_v48  ;;  %v3746_v38 = vsel %vm1308_vm15, %v1276_v23, %v1340_v4  ;;  %v800_v11 = vadd.f32 %v3672_v43, %v3614_v16  ;;  %v1407_v16 = vld [vmem:[%s4462_s4 + $0x70] sm:$0xff] }
 0x1ee   : > { %v1279_v10 = vadd.f32 %v1223_v30, %v1151_v51  ;;  %v1152_v32 = vadd.f32 %v1086_v52, %v788_v14  ;;  %vm1310_vm1 = vcmp.gt.f32.partialorder %v1278_v49, 0.0  ;;  %v3744_v61 = vsel %vm1309_vm14, %v1277_v27, %v1341_v54  ;;  %v821_v43 = vpop.f32.mrf.mxu1  ;;  %2601 = vmatmul.mubr.msk.f32.gmra.mxu1 %vm419_vm0, %v1407_v16 }
 0x1ef   : > { %v1090_v20 = vpop.f32.mrf.mxu0  ;;  %v1342_v12 = vmul.f32 0.01, %v1278_v49  ;;  %v1728_v57 = vmul.f32 %v3659_v50, %v3744_v61  ;;  %v2039_v27 = vmul.f32 %v3659_v50, %v3746_v38 }
 0x1f0   : > { %v1280_v35 = vadd.f32 %v1223_v30, %v1152_v32  ;;  %v1153_v5 = vadd.f32 %v1090_v20, %v792_v9  ;;  %1748 = vadd.xlane.f32.xlu0 %v1727_v37  ;;  %vm1311_vm2 = vcmp.gt.f32.partialorder %v1279_v10, 0.0  ;;  %v1343_v47 = vmul.f32 0.01, %v1279_v10 }
 0x1f1   : > { %v1092_v62 = vpop.f32.mrf.mxu0  ;;  %v3750_v24 = vsel %vm1310_vm1, %v1278_v49, %v1342_v12  ;;  %1750 = vadd.xlane.f32.xlu1 %v1728_v57  ;;  %v1238_v57 = vpop.permute.xlu1 %1237 }
 0x1f2   : > { %v1281_v42 = vadd.f32 %v1228_v39, %v1153_v5  ;;  %v1154_v23 = vadd.f32 %v1092_v62, %v794_v3  ;;  %v2040_v14 = vmul.f32 %v3659_v50, %v3750_v24  ;;  %v3762_v60 = vsel %vm1311_vm2, %v1279_v10, %v1343_v47  ;;  %v823_v62 = vpop.f32.mrf.mxu1 }
 0x1f3   : > { %v1096_v58 = vpop.f32.mrf.mxu0  ;;  %v1344_v48 = vmul.f32 0.01, %v1280_v35  ;;  %vm1312_vm4 = vcmp.gt.f32.partialorder %v1280_v35, 0.0  ;;  %v1729_v54 = vmul.f32 %v3659_v50, %v3762_v60  ;;  %v806_v10 = vadd.f32 %v3698_v46, %v3620_v19 }
 0x1f4   : > { %v1282_v4 = vadd.f32 %v1228_v39, %v1154_v23  ;;  %v1155_v49 = vadd.f32 %v1096_v58, %v798_v13  ;;  %2060 = vadd.xlane.f32.xlu0 %v2039_v27  ;;  %vm1313_vm3 = vcmp.gt.f32.partialorder %v1281_v42, 0.0  ;;  %v1345_v9 = vmul.f32 0.01, %v1281_v42 }
 0x1f5   : > { %v1098_v51 = vpop.f32.mrf.mxu0  ;;  %2062 = vadd.xlane.f32.xlu1 %v2040_v14  ;;  %v3778_v32 = vsel %vm1312_vm4, %v1280_v35, %v1344_v48  ;;  %v4479_v3 = vmov 0.0   ;;  %v810_v35 = vadd.f32 %v3710_v8, %v3624_v21  ;;  %v812_v23 = vadd.f32 %v3724_v0, %v3626_v22  ;;  %v1243_v21 = vpop.permute.xlu0 %1242 }
 0x1f6   : > { %v1283_v30 = vadd.f32 %v1233_v15, %v1155_v49  ;;  %v1156_v52 = vadd.f32 %v1098_v51, %v800_v11  ;;  %vm1314_vm5 = vcmp.gt.f32.partialorder %v1282_v4, 0.0  ;;  %v3775_v59 = vsel %vm1313_vm3, %v1281_v42, %v1345_v9  ;;  %1708 = vmatprep.mubr.f32.mxu1 %v4479_v3  ;;  %v1248_v3 = vpop.permute.xlu1 %1247 }
 0x1f7   : > { %v1102_v18 = vpop.f32.mrf.mxu0  ;;  %v1346_v37 = vmul.f32 0.01, %v1282_v4  ;;  %v1730_v5 = vmul.f32 %v3659_v50, %v3775_v59  ;;  %v2041_v42 = vmul.f32 %v3659_v50, %v3778_v32  ;;  %v816_v8 = vadd.f32 %v3738_v36, %v3630_v25 }
 0x1f8   : > { %v1284_v20 = vadd.f32 %v1233_v15, %v1156_v52  ;;  %v1157_v12 = vadd.f32 %v1102_v18, %v804_v53  ;;  %1752 = vadd.xlane.f32.xlu0 %v1729_v54  ;;  %vm1315_vm6 = vcmp.gt.f32.partialorder %v1283_v30, 0.0  ;;  %v1347_v46 = vmul.f32 0.01, %v1283_v30  ;;  %v1408_v15 = vld [vmem:[%s4462_s4 + $0x78] sm:$0xff]  ;;  %v827_v53 = vpop.f32.mrf.mxu1 }
 0x1f9   : > { %v1104_v39 = vpop.f32.mrf.mxu0  ;;  %v3783_v19 = vsel %vm1314_vm5, %v1282_v4, %v1346_v37  ;;  %1754 = vadd.xlane.f32.xlu1 %v1730_v5  ;;  %2602 = vmatmul.mubr.msk.f32.gmra.mxu1 %vm419_vm0, %v1408_v15  ;;  %v818_v25 = vadd.f32 %v3752_v6, %v3632_v26 }
 0x1fa   : > { %v1285_v47 = vadd.f32 %v1238_v57, %v1157_v12  ;;  %v1158_v13 = vadd.f32 %v1104_v39, %v806_v10  ;;  %v2042_v11 = vmul.f32 %v3659_v50, %v3783_v19  ;;  %v3793_v58 = vsel %vm1315_vm6, %v1283_v30, %v1347_v46  ;;  %v829_v6 = vpop.f32.mrf.mxu1 }
 0x1fb   : > { %v1108_v27 = vpop.f32.mrf.mxu0  ;;  %v1348_v14 = vmul.f32 0.01, %v1284_v20  ;;  %vm1316_vm8 = vcmp.gt.f32.partialorder %v1284_v20, 0.0  ;;  %v1731_v22 = vmul.f32 %v3659_v50, %v3793_v58  ;;  %v822_v12 = vadd.f32 %v821_v43, %v3636_v28 }
 0x1fc   : > { %v1286_v48 = vadd.f32 %v1238_v57, %v1158_v13  ;;  %v1159_v4 = vadd.f32 %v1108_v27, %v810_v35  ;;  %2064 = vadd.xlane.f32.xlu0 %v2041_v42  ;;  %vm1317_vm7 = vcmp.gt.f32.partialorder %v1285_v47, 0.0  ;;  %v1349_v0 = vmul.f32 0.01, %v1285_v47 }
 0x1fd   : > { %v1110_v49 = vpop.f32.mrf.mxu0  ;;  %2066 = vadd.xlane.f32.xlu1 %v2042_v11  ;;  %v3809_v52 = vsel %vm1316_vm8, %v1284_v20, %v1348_v14  ;;  %v824_v57 = vadd.f32 %v823_v62, %v3638_v29  ;;  %v1253_v29 = vpop.permute.xlu0 %1252  ;;  %v828_v62 = vadd.f32 %v827_v53, %v3642_v31 }
 0x1fe   : > { %vm1318_vm9 = vcmp.gt.f32.partialorder %v1286_v48, 0.0  ;;  %v1350_v51 = vmul.f32 0.01, %v1286_v48  ;;  %v1287_v9 = vadd.f32 %v1243_v21, %v1159_v4  ;;  %v1160_v16 = vadd.f32 %v1110_v49, %v812_v23  ;;  %v833_v11 = vpop.f32.mrf.mxu1 }
 0x1ff   : > { %v1114_v36 = vpop.f32.mrf.mxu0  ;;  %v3806_v30 = vsel %vm1317_vm7, %v1285_v47, %v1349_v0  ;;  %v2043_v46 = vmul.f32 %v3659_v50, %v3809_v52 }
 0x200   : > { %v1288_v54 = vadd.f32 %v1243_v21, %v1160_v16  ;;  %v1161_v10 = vadd.f32 %v1114_v36, %v816_v8  ;;  %1756 = vadd.xlane.f32.xlu0 %v1731_v22  ;;  %v1732_v18 = vmul.f32 %v3659_v50, %v3806_v30  ;;  %v3813_v37 = vsel %vm1318_vm9, %v1286_v48, %v1350_v51  ;;  %v1258_v51 = vpop.permute.xlu1 %1257 }
 0x201   : > { %v1116_v5 = vpop.f32.mrf.mxu0  ;;  %vm1319_vm0 = vcmp.gt.f32.partialorder %v1287_v9, 0.0  ;;  %v1351_v26 = vmul.f32 0.01, %v1287_v9  ;;  %v2044_v13 = vmul.f32 %v3659_v50, %v3813_v37  ;;  %v830_v8 = vadd.f32 %v829_v6, %v3644_v7 }
 0x202   : > { %v1289_v39 = vadd.f32 %v1248_v3, %v1161_v10  ;;  %v1162_v20 = vadd.f32 %v1116_v5, %v818_v25  ;;  %1758 = vadd.xlane.f32.xlu1 %v1732_v18  ;;  %vm1320_vm10 = vcmp.gt.f32.partialorder %v1288_v54, 0.0  ;;  %v1352_v35 = vmul.f32 0.01, %v1288_v54  ;;  %v835_v25 = vpop.f32.mrf.mxu1 }
 0x203   : > { %v1120_v47 = vpop.f32.mrf.mxu0  ;;  %v3821_v42 = vsel %vm1319_vm0, %v1287_v9, %v1351_v26  ;;  %v834_v9 = vadd.f32 %v833_v11, %v3648_v33 }
 0x204   : > { %vm1321_vm11 = vcmp.gt.f32.partialorder %v1289_v39, 0.0  ;;  %v1353_v28 = vmul.f32 0.01, %v1289_v39  ;;  %v1290_v43 = vadd.f32 %v1248_v3, %v1162_v20  ;;  %v1163_v23 = vadd.f32 %v1120_v47, %v822_v12  ;;  %2068 = vadd.xlane.f32.xlu0 %v2043_v46  ;;  %v4480_v3 = vld [vmem:[#allocation4_spill] sm:$0xff]  ;;  %v1263_v20 = vpop.permute.xlu0 %1262 }
 0x205   : > { %v1122_v27 = vpop.f32.mrf.mxu0  ;;  %v1733_v21 = vmul.f32 %v3659_v50, %v3821_v42  ;;  %v3831_v0 = vsel %vm1320_vm10, %v1288_v54, %v1352_v35  ;;  %v836_v12 = vadd.f32 %v835_v25, %v4480_v3 }
 0x206   : > { %v1354_v14 = vmul.f32 0.01, %v1290_v43  ;;  %v1291_v48 = vadd.f32 %v1253_v29, %v1163_v23  ;;  %v1164_v4 = vadd.f32 %v1122_v27, %v824_v57  ;;  %2070 = vadd.xlane.f32.xlu1 %v2044_v13  ;;  %vm1322_vm12 = vcmp.gt.f32.partialorder %v1290_v43, 0.0 }
 0x207   : > { %v1126_v49 = vpop.f32.mrf.mxu0  ;;  %v3828_v22 = vsel %vm1321_vm11, %v1289_v39, %v1353_v28  ;;  %v2045_v18 = vmul.f32 %v3659_v50, %v3831_v0 }
 0x208   : > { %vm1323_vm13 = vcmp.gt.f32.partialorder %v1291_v48, 0.0  ;;  %v1355_v31 = vmul.f32 0.01, %v1291_v48  ;;  %v1292_v15 = vadd.f32 %v1253_v29, %v1164_v4  ;;  %v1165_v53 = vadd.f32 %v1126_v49, %v828_v62  ;;  %1760 = vadd.xlane.f32.xlu0 %v1733_v21 }
 0x209   : > { %v1128_v16 = vpop.f32.mrf.mxu0  ;;  %v1734_v7 = vmul.f32 %v3659_v50, %v3828_v22  ;;  %v3839_v54 = vsel %vm1322_vm12, %v1290_v43, %v1354_v14 }
 0x20a   : > { %v1293_v36 = vadd.f32 %v1258_v51, %v1165_v53  ;;  %v1166_v10 = vadd.f32 %v1128_v16, %v830_v8  ;;  %vm1324_vm14 = vcmp.gt.f32.partialorder %v1292_v15, 0.0  ;;  %v1356_v5 = vmul.f32 0.01, %v1292_v15  ;;  %v2583_v53 = vld [vmem:[%s4460_s2 + $0xe0] sm:$0xff] }
 0x20b   : > { %1762 = vadd.xlane.f32.xlu1 %v1734_v7  ;;  %v1132_v26 = vpop.f32.mrf.mxu0  ;;  %v3843_v33 = vsel %vm1323_vm13, %v1291_v48, %v1355_v31  ;;  %v2046_v35 = vmul.f32 %v3659_v50, %v3839_v54  ;;  %v3880_v7 = vpop.permute.xlu0 %1433 }
 0x20c   : > { %vm1325_vm15 = vcmp.gt.f32.partialorder %v1293_v36, 0.0  ;;  %v1357_v6 = vmul.f32 0.01, %v1293_v36  ;;  %v1294_v57 = vadd.f32 %v1258_v51, %v1166_v10  ;;  %v1167_v39 = vadd.f32 %v1132_v26, %v834_v9  ;;  %2072 = vadd.xlane.f32.xlu0 %v2045_v18  ;;  %v2584_v51 = vld [vmem:[%s4460_s2 + $0xe8] sm:$0xff]  ;;  %v3876_v9 = vpop.permute.xlu1 %1428 }
 0x20d   : > { %v1134_v46 = vpop.f32.mrf.mxu0  ;;  %v1735_v43 = vmul.f32 %v3659_v50, %v3843_v33  ;;  %v3852_v29 = vsel %vm1324_vm14, %v1292_v15, %v1356_v5 }
 0x20e   : > { %v1358_v47 = vmul.f32 0.01, %v1294_v57  ;;  %v1295_v13 = vadd.f32 %v1263_v20, %v1167_v39  ;;  %v1168_v28 = vadd.f32 %v1134_v46, %v836_v12  ;;  %vm1326_vm1 = vcmp.gt.f32.partialorder %v1294_v57, 0.0 }
 0x20f   : > { %2074 = vadd.xlane.f32.xlu1 %v2046_v35  ;;  %v3849_v23 = vsel %vm1325_vm15, %v1293_v36, %v1357_v6  ;;  %v2047_v14 = vmul.f32 %v3659_v50, %v3852_v29  ;;  %v3884_v36 = vpop.permute.xlu0 %1443 }
 0x210   : > { %vm1327_vm2 = vcmp.gt.f32.partialorder %v1295_v13, 0.0  ;;  %v1359_v62 = vmul.f32 0.01, %v1295_v13  ;;  %v1296_v27 = vadd.f32 %v1263_v20, %v1168_v28  ;;  %1764 = vadd.xlane.f32.xlu0 %v1735_v43  ;;  %v1736_v11 = vmul.f32 %v3659_v50, %v3849_v23  ;;  %v3878_v16 = vpop.permute.xlu1 %1438 }
 0x211   : > { %v3858_v48 = vsel %vm1326_vm1, %v1294_v57, %v1358_v47 }
 0x212   : > { %v1360_v4 = vmul.f32 0.01, %v1296_v27  ;;  %v3860_v21 = vsel %vm1327_vm2, %v1295_v13, %v1359_v62  ;;  %vm1328_vm3 = vcmp.gt.f32.partialorder %v1296_v27, 0.0  ;;  %v2048_v8 = vmul.f32 %v3659_v50, %v3858_v48 }
 0x213   : > { %1766 = vadd.xlane.f32.xlu1 %v1736_v11  ;;  %v1737_v49 = vmul.f32 %v3659_v50, %v3860_v21  ;;  %v3888_v18 = vpop.permute.xlu0 %1453 }
 0x214   : > { %2076 = vadd.xlane.f32.xlu0 %v2047_v14  ;;  %v3866_v31 = vsel %vm1328_vm3, %v1296_v27, %v1360_v4  ;;  %v3882_v25 = vpop.permute.xlu1 %1448 }
 0x215   : > { %v2049_v15 = vmul.f32 %v3659_v50, %v3866_v31 }
 0x217   : > { %2078 = vadd.xlane.f32.xlu1 %v2048_v8  ;;  %v3892_v12 = vpop.permute.xlu0 %1468 }
 0x218   : > { %1768 = vadd.xlane.f32.xlu0 %v1737_v49  ;;  %v3886_v10 = vpop.permute.xlu1 %1458 }
 0x21b   : > { %v3896_v26 = vpop.permute.xlu0 %1483 }
 0x21c   : > { %2080 = vadd.xlane.f32.xlu0 %v2049_v15  ;;  %v3890_v3 = vpop.permute.xlu1 %1463  ;;  %4481 = vst [vmem:[#allocation4_spill] sm:$0xff] %v3896_v26 }
 0x220   : > { %v3894_v5 = vpop.permute.xlu1 %1473 }
 0x224   : > { %v3898_v6 = vpop.permute.xlu1 %1478 }
 0x228   : > { %1488 = vperm.xlu1 %2644, %v2583_v53  }
 0x232   : > { %1493 = vperm.xlu0 %2643, %v2584_v51  }
 0x262   : > { %v1739_v57 = vpop.xlane.xlu0 %1738 }
 0x263   : > { %v1770_v39 = vmul.f32 0.008474576, %v1739_v57 }
 0x265   : > { %v1786_v20 = vsub.f32 %v3663_v56, %v1770_v39  ;;  %v2051_v46 = vpop.xlane.xlu1 %2050 }
 0x266   : > { %v2082_v35 = vmul.f32 0.008474576, %v2051_v46 }
 0x267   : > { %v3902_v47 = vmul.f32 %v3659_v50, %v1786_v20 }
 0x268   : > { %v2098_v13 = vsub.f32 %v3670_v34, %v2082_v35 }
 0x269   : > { %v1741_v28 = vpop.xlane.xlu1 %1740  ;;  %v2053_v43 = vpop.xlane.xlu0 %2052  ;;  %v1818_v62 = vmul.f32 %v3902_v47, %v3902_v47 }
 0x26a   : > { %v3908_v27 = vmul.f32 %v3659_v50, %v2098_v13  ;;  %v1771_v11 = vmul.f32 0.008474576, %v1741_v28  ;;  %v2083_v14 = vmul.f32 0.008474576, %v2053_v43 }
 0x26b   : > { %1834 = vadd.xlane.f32.xlu1 %v1818_v62 }
 0x26c   : > { %v1787_v56 = vsub.f32 %v3676_v45, %v1771_v11  ;;  %v2099_v4 = vsub.f32 %v3684_v55, %v2083_v14  ;;  %v2130_v34 = vmul.f32 %v3908_v27, %v3908_v27 }
 0x26d   : > { %v2055_v8 = vpop.xlane.xlu1 %2054  ;;  %v1743_v49 = vpop.xlane.xlu0 %1742 }
 0x26e   : > { %v3915_v15 = vmul.f32 %v3659_v50, %v1787_v56  ;;  %v2084_v53 = vmul.f32 0.008474576, %v2055_v8  ;;  %v1772_v51 = vmul.f32 0.008474576, %v1743_v49  ;;  %v3918_v57 = vmul.f32 %v3659_v50, %v2099_v4 }
 0x26f   : > { %2146 = vadd.xlane.f32.xlu1 %v2130_v34 }
 0x270   : > { %v2100_v39 = vsub.f32 %v3696_v1, %v2084_v53  ;;  %v1788_v45 = vsub.f32 %v3690_v41, %v1772_v51  ;;  %v1819_v55 = vmul.f32 %v3915_v15, %v3915_v15  ;;  %v2131_v1 = vmul.f32 %v3918_v57, %v3918_v57 }
 0x271   : > { %v1745_v20 = vpop.xlane.xlu0 %1744 }
 0x272   : > { %v3925_v46 = vmul.f32 %v3659_v50, %v1788_v45  ;;  %v1773_v35 = vmul.f32 0.008474576, %v1745_v20  ;;  %1836 = vadd.xlane.f32.xlu0 %v1819_v55  ;;  %v3928_v13 = vmul.f32 %v3659_v50, %v2100_v39  ;;  %v1747_v28 = vpop.xlane.xlu1 %1746 }
 0x273   : > { %v1774_v62 = vmul.f32 0.008474576, %v1747_v28 }
 0x274   : > { %v1789_v43 = vsub.f32 %v3706_v2, %v1773_v35  ;;  %v1820_v41 = vmul.f32 %v3925_v46, %v3925_v46  ;;  %v2132_v2 = vmul.f32 %v3928_v13, %v3928_v13 }
 0x275   : > { %v2057_v11 = vpop.xlane.xlu0 %2056  ;;  %v1790_v56 = vsub.f32 %v3716_v40, %v1774_v62 }
 0x276   : > { %v3936_v14 = vmul.f32 %v3659_v50, %v1789_v43  ;;  %v2085_v4 = vmul.f32 0.008474576, %v2057_v11  ;;  %2148 = vadd.xlane.f32.xlu0 %v2131_v1  ;;  %1838 = vadd.xlane.f32.xlu1 %v1820_v41  ;;  %v2059_v8 = vpop.xlane.xlu1 %2058 }
 0x277   : > { %v3942_v49 = vmul.f32 %v3659_v50, %v1790_v56  ;;  %v2086_v53 = vmul.f32 0.008474576, %v2059_v8 }
 0x278   : > { %v2101_v34 = vsub.f32 %v3718_v63, %v2085_v4  ;;  %v1821_v51 = vmul.f32 %v3936_v14, %v3936_v14 }
 0x279   : > { %v1749_v39 = vpop.xlane.xlu0 %1748  ;;  %v2102_v40 = vsub.f32 %v3722_v44, %v2086_v53  ;;  %v1822_v35 = vmul.f32 %v3942_v49, %v3942_v49 }
 0x27a   : > { %v3948_v45 = vmul.f32 %v3659_v50, %v2101_v34  ;;  %v1775_v55 = vmul.f32 0.008474576, %v1749_v39  ;;  %2150 = vadd.xlane.f32.xlu1 %v2132_v2  ;;  %1840 = vadd.xlane.f32.xlu0 %v1821_v51  ;;  %v1751_v20 = vpop.xlane.xlu1 %1750 }
 0x27b   : > { %v3954_v28 = vmul.f32 %v3659_v50, %v2102_v40  ;;  %v1776_v43 = vmul.f32 0.008474576, %v1751_v20 }
 0x27c   : > { %v1791_v63 = vsub.f32 %v3734_v17, %v1775_v55  ;;  %v2133_v62 = vmul.f32 %v3948_v45, %v3948_v45 }
 0x27d   : > { %v2061_v1 = vpop.xlane.xlu0 %2060  ;;  %v1792_v44 = vsub.f32 %v3744_v61, %v1776_v43  ;;  %v2134_v4 = vmul.f32 %v3954_v28, %v3954_v28 }
 0x27e   : > { %v3960_v41 = vmul.f32 %v3659_v50, %v1791_v63  ;;  %v2087_v11 = vmul.f32 0.008474576, %v2061_v1  ;;  %1842 = vadd.xlane.f32.xlu1 %v1822_v35  ;;  %2152 = vadd.xlane.f32.xlu0 %v2133_v62  ;;  %v2063_v56 = vpop.xlane.xlu1 %2062 }
 0x27f   : > { %v3966_v8 = vmul.f32 %v3659_v50, %v1792_v44  ;;  %v2088_v2 = vmul.f32 0.008474576, %v2063_v56 }
 0x280   : > { %v2103_v17 = vsub.f32 %v3746_v38, %v2087_v11  ;;  %v1823_v34 = vmul.f32 %v3960_v41, %v3960_v41 }
 0x281   : > { %v1753_v53 = vpop.xlane.xlu0 %1752  ;;  %v2104_v61 = vsub.f32 %v3750_v24, %v2088_v2  ;;  %v1824_v55 = vmul.f32 %v3966_v8, %v3966_v8 }
 0x282   : > { %v3972_v51 = vmul.f32 %v3659_v50, %v2103_v17  ;;  %v1777_v39 = vmul.f32 0.008474576, %v1753_v53  ;;  %2154 = vadd.xlane.f32.xlu1 %v2134_v4  ;;  %1844 = vadd.xlane.f32.xlu0 %v1823_v34  ;;  %v1755_v40 = vpop.xlane.xlu1 %1754 }
 0x283   : > { %v3978_v20 = vmul.f32 %v3659_v50, %v2104_v61  ;;  %v1778_v35 = vmul.f32 0.008474576, %v1755_v40 }
 0x284   : > { %v1793_v38 = vsub.f32 %v3762_v60, %v1777_v39  ;;  %v2135_v63 = vmul.f32 %v3972_v51, %v3972_v51 }
 0x285   : > { %v2065_v43 = vpop.xlane.xlu0 %2064  ;;  %v1794_v24 = vsub.f32 %v3775_v59, %v1778_v35  ;;  %v2136_v11 = vmul.f32 %v3978_v20, %v3978_v20 }
 0x286   : > { %v3984_v62 = vmul.f32 %v3659_v50, %v1793_v38  ;;  %v2089_v1 = vmul.f32 0.008474576, %v2065_v43  ;;  %1846 = vadd.xlane.f32.xlu1 %v1824_v55  ;;  %2156 = vadd.xlane.f32.xlu0 %v2135_v63  ;;  %v2067_v44 = vpop.xlane.xlu1 %2066 }
 0x287   : > { %v3990_v56 = vmul.f32 %v3659_v50, %v1794_v24  ;;  %v2090_v4 = vmul.f32 0.008474576, %v2067_v44 }
 0x288   : > { %v2105_v60 = vsub.f32 %v3778_v32, %v2089_v1  ;;  %v1825_v17 = vmul.f32 %v3984_v62, %v3984_v62 }
 0x289   : > { %v1757_v2 = vpop.xlane.xlu0 %1756  ;;  %v2106_v59 = vsub.f32 %v3783_v19, %v2090_v4  ;;  %v1826_v39 = vmul.f32 %v3990_v56, %v3990_v56 }
 0x28a   : > { %v3996_v34 = vmul.f32 %v3659_v50, %v2105_v60  ;;  %v1779_v53 = vmul.f32 0.008474576, %v1757_v2  ;;  %2158 = vadd.xlane.f32.xlu1 %v2136_v11  ;;  %1848 = vadd.xlane.f32.xlu0 %v1825_v17 }
 0x28b   : > { %v1759_v61 = vpop.xlane.xlu1 %1758  ;;  %v4002_v40 = vmul.f32 %v3659_v50, %v2106_v59 }
 0x28c   : > { %v1795_v32 = vsub.f32 %v3793_v58, %v1779_v53  ;;  %v1780_v55 = vmul.f32 0.008474576, %v1759_v61  ;;  %v2137_v38 = vmul.f32 %v3996_v34, %v3996_v34 }
 0x28d   : > { %v2069_v35 = vpop.xlane.xlu0 %2068  ;;  %v2138_v1 = vmul.f32 %v4002_v40, %v4002_v40 }
 0x28e   : > { %v4008_v63 = vmul.f32 %v3659_v50, %v1795_v32  ;;  %v1796_v19 = vsub.f32 %v3806_v30, %v1780_v55  ;;  %v2091_v43 = vmul.f32 0.008474576, %v2069_v35  ;;  %1850 = vadd.xlane.f32.xlu1 %v1826_v39  ;;  %2160 = vadd.xlane.f32.xlu0 %v2137_v38 }
 0x28f   : > { %v2071_v24 = vpop.xlane.xlu1 %2070 }
 0x290   : > { %v4014_v44 = vmul.f32 %v3659_v50, %v1796_v19  ;;  %v2107_v58 = vsub.f32 %v3809_v52, %v2091_v43  ;;  %v2092_v11 = vmul.f32 0.008474576, %v2071_v24  ;;  %v1827_v60 = vmul.f32 %v4008_v63, %v4008_v63 }
 0x291   : > { %v1761_v4 = vpop.xlane.xlu0 %1760 }
 0x292   : > { %v4020_v17 = vmul.f32 %v3659_v50, %v2107_v58  ;;  %v2108_v30 = vsub.f32 %v3813_v37, %v2092_v11  ;;  %v1781_v2 = vmul.f32 0.008474576, %v1761_v4  ;;  %2162 = vadd.xlane.f32.xlu1 %v2138_v1  ;;  %1852 = vadd.xlane.f32.xlu0 %v1827_v60  ;;  %v1828_v52 = vmul.f32 %v4014_v44, %v4014_v44 }
 0x294   : > { %v4024_v59 = vmul.f32 %v3659_v50, %v2108_v30  ;;  %v1797_v53 = vsub.f32 %v3821_v42, %v1781_v2  ;;  %v1763_v61 = vpop.xlane.xlu1 %1762  ;;  %v2139_v39 = vmul.f32 %v4020_v17, %v4020_v17 }
 0x295   : > { %v1782_v32 = vmul.f32 0.008474576, %v1763_v61  ;;  %v2073_v55 = vpop.xlane.xlu0 %2072 }
 0x296   : > { %v4032_v38 = vmul.f32 %v3659_v50, %v1797_v53  ;;  %v2093_v37 = vmul.f32 0.008474576, %v2073_v55  ;;  %1854 = vadd.xlane.f32.xlu1 %v1828_v52  ;;  %2164 = vadd.xlane.f32.xlu0 %v2139_v39  ;;  %v2140_v43 = vmul.f32 %v4024_v59, %v4024_v59 }
 0x297   : > { %v1798_v35 = vsub.f32 %v3828_v22, %v1782_v32 }
 0x298   : > { %v2109_v19 = vsub.f32 %v3831_v0, %v2093_v37  ;;  %v2075_v42 = vpop.xlane.xlu1 %2074  ;;  %v1829_v24 = vmul.f32 %v4032_v38, %v4032_v38 }
 0x299   : > { %v4041_v1 = vmul.f32 %v3659_v50, %v1798_v35  ;;  %v2094_v58 = vmul.f32 0.008474576, %v2075_v42  ;;  %v1765_v11 = vpop.xlane.xlu0 %1764 }
 0x29a   : > { %v4044_v60 = vmul.f32 %v3659_v50, %v2109_v19  ;;  %v1783_v4 = vmul.f32 0.008474576, %v1765_v11  ;;  %2166 = vadd.xlane.f32.xlu1 %v2140_v43  ;;  %1856 = vadd.xlane.f32.xlu0 %v1829_v24 }
 0x29b   : > { %4482 = vst [vmem:[#allocation5_spill] sm:$0xff] %v4041_v1  ;;  %v2110_v22 = vsub.f32 %v3839_v54, %v2094_v58  ;;  %v1830_v2 = vmul.f32 %v4041_v1, %v4041_v1 }
 0x29c   : > { %4483 = vst [vmem:[#allocation6_spill] sm:$0xff] %v4044_v60  ;;  %v1799_v0 = vsub.f32 %v3843_v33, %v1783_v4  ;;  %v1767_v30 = vpop.xlane.xlu1 %1766  ;;  %v2141_v53 = vmul.f32 %v4044_v60, %v4044_v60 }
 0x29d   : > { %v4053_v61 = vmul.f32 %v3659_v50, %v2110_v22  ;;  %v1784_v52 = vmul.f32 0.008474576, %v1767_v30  ;;  %v2077_v39 = vpop.xlane.xlu0 %2076 }
 0x29e   : > { %v4056_v32 = vmul.f32 %v3659_v50, %v1799_v0  ;;  %v2095_v55 = vmul.f32 0.008474576, %v2077_v39  ;;  %1858 = vadd.xlane.f32.xlu1 %v1830_v2  ;;  %2168 = vadd.xlane.f32.xlu0 %v2141_v53 }
 0x29f   : > { %4484 = vst [vmem:[#allocation7_spill] sm:$0xff] %v4053_v61  ;;  %v1800_v54 = vsub.f32 %v3849_v23, %v1784_v52  ;;  %v2142_v35 = vmul.f32 %v4053_v61, %v4053_v61 }
 0x2a0   : > { %4485 = vst [vmem:[#allocation8_spill] sm:$0xff] %v4056_v32  ;;  %v2111_v33 = vsub.f32 %v3852_v29, %v2095_v55  ;;  %v2079_v37 = vpop.xlane.xlu1 %2078  ;;  %v1831_v19 = vmul.f32 %v4056_v32, %v4056_v32 }
 0x2a1   : > { %v4065_v42 = vmul.f32 %v3659_v50, %v1800_v54  ;;  %v2096_v43 = vmul.f32 0.008474576, %v2079_v37  ;;  %v1769_v24 = vpop.xlane.xlu0 %1768  ;;  %v2585_v54 = vld [vmem:[%s4460_s2 + $0xf0] sm:$0xff] }
 0x2a2   : > { %v4068_v58 = vmul.f32 %v3659_v50, %v2111_v33  ;;  %v1785_v11 = vmul.f32 0.008474576, %v1769_v24  ;;  %2170 = vadd.xlane.f32.xlu1 %v2142_v35  ;;  %1860 = vadd.xlane.f32.xlu0 %v1831_v19  ;;  %v1620_v33 = vpop.f32.mrf.mxu1 }
 0x2a3   : > { %4486 = vst [vmem:[#allocation9_spill] sm:$0xff] %v4065_v42  ;;  %v2112_v23 = vsub.f32 %v3858_v48, %v2096_v43  ;;  %v1832_v4 = vmul.f32 %v4065_v42, %v4065_v42 }
 0x2a4   : > { %4487 = vst [vmem:[#allocation10_spill] sm:$0xff] %v4068_v58  ;;  %v1801_v29 = vsub.f32 %v3860_v21, %v1785_v11  ;;  %v2143_v22 = vmul.f32 %v4068_v58, %v4068_v58  ;;  %v1622_v37 = vpop.f32.mrf.mxu1 }
 0x2a5   : > { %v4077_v0 = vmul.f32 %v3659_v50, %v2112_v23  ;;  %v2081_v30 = vpop.xlane.xlu0 %2080 }
 0x2a6   : > { %v4080_v2 = vmul.f32 %v3659_v50, %v1801_v29  ;;  %v2097_v53 = vmul.f32 0.008474576, %v2081_v30  ;;  %1862 = vadd.xlane.f32.xlu1 %v1832_v4  ;;  %2172 = vadd.xlane.f32.xlu0 %v2143_v22  ;;  %v4098_v29 = vpop.permute.xlu1 %1488 }
 0x2a7   : > { %4488 = vst [vmem:[#allocation11_spill] sm:$0xff] %v4077_v0  ;;  %v2144_v21 = vmul.f32 %v4077_v0, %v4077_v0  ;;  %4491 = vst [vmem:[#allocation14_spill] sm:$0xff] %v4098_v29 }
 0x2a8   : > { %4489 = vst [vmem:[#allocation12_spill] sm:$0xff] %v4080_v2  ;;  %v2113_v48 = vsub.f32 %v3866_v31, %v2097_v53  ;;  %v1833_v52 = vmul.f32 %v4080_v2, %v4080_v2  ;;  %v2586_v31 = vld [vmem:[%s4460_s2 + $0xf8] sm:$0xff] }
 0x2aa   : > { %v4088_v39 = vmul.f32 %v3659_v50, %v2113_v48  ;;  %2174 = vadd.xlane.f32.xlu1 %v2144_v21  ;;  %1864 = vadd.xlane.f32.xlu0 %v1833_v52  ;;  %v1626_v50 = vpop.f32.mrf.mxu1 }
 0x2ac   : > { %4490 = vst [vmem:[#allocation13_spill] sm:$0xff] %v4088_v39  ;;  %v2145_v55 = vmul.f32 %v4088_v39, %v4088_v39  ;;  %v1628_v35 = vpop.f32.mrf.mxu1 }
 0x2ad   : > { %v4100_v48 = vpop.permute.xlu0 %1493 }
 0x2ae   : > { %2176 = vadd.xlane.f32.xlu0 %v2145_v55  ;;  %v1632_v19 = vpop.f32.mrf.mxu1  ;;  %4492 = vst [vmem:[#allocation15_spill] sm:$0xff] %v4100_v48 }
 0x2b0   : > { %v1634_v43 = vpop.f32.mrf.mxu1 }
 0x2b2   : > { %v1638_v24 = vpop.f32.mrf.mxu1 }
 0x2b4   : > { %v1640_v11 = vpop.f32.mrf.mxu1 }
 0x2b6   : > { %v1644_v23 = vpop.f32.mrf.mxu1 }
 0x2b8   : > { %v1646_v4 = vpop.f32.mrf.mxu1 }
 0x2ba   : > { %v1650_v53 = vpop.f32.mrf.mxu1 }
 0x2bb   : > { %1498 = vperm.xlu1 %2644, %v2585_v54  }
 0x2bc   : > { %v1652_v54 = vpop.f32.mrf.mxu1 }
 0x2be   : > { %v1656_v0 = vpop.f32.mrf.mxu1 }
 0x2c4   : > { %1503 = vperm.xlu0 %2643, %v2586_v31  }
 0x2f4   : > { %v1835_v22 = vpop.xlane.xlu1 %1834 }
 0x2f5   : > { %v1866_v30 = vmul.f32 0.008474576, %v1835_v22  ;;  %v1658_v22 = vpop.f32.mrf.mxu1 }
 0x2f7   : > { %v1882_v21 = vadd.f32 1e-05, %v1866_v30  ;;  %v1662_v26 = vpop.f32.mrf.mxu1 }
 0x2f8   : > { %v2147_v52 = vpop.xlane.xlu1 %2146 }
 0x2f9   : > { %2645 = vrsqrt.f32 %v1882_v21  ;;  %v2178_v55 = vmul.f32 0.008474576, %v2147_v52 }
 0x2fb   : > { %v2194_v31 = vadd.f32 1e-05, %v2178_v55  ;;  %v1837_v39 = vpop.xlane.xlu0 %1836 }
 0x2fc   : > { %v1867_v2 = vmul.f32 0.008474576, %v1837_v39 }
 0x2fd   : > { %2647 = vrsqrt.f32 %v2194_v31  ;;  %v4119_v31 = vld [vmem:[%s4461_s3 + $0x1] ss:$0 sm:$0xff] }
 0x2fe   : > { %v1883_v58 = vadd.f32 1e-05, %v1867_v2  ;;  %v4105_v2 = vld [vmem:[%s4461_s3] ss:$0 sm:$0xff] }
 0x2ff   : > { %v1839_v42 = vpop.xlane.xlu1 %1838  ;;  %v2149_v32 = vpop.xlane.xlu0 %2148 }
 0x300   : > { %2649 = vrsqrt.f32 %v1883_v58  ;;  %v1868_v29 = vmul.f32 0.008474576, %v1839_v42  ;;  %v2179_v61 = vmul.f32 0.008474576, %v2149_v32  ;;  %v1621_v32 = vadd.f32 %v1620_v33, %v3876_v9 }
 0x301   : > { %v1623_v42 = vadd.f32 %v1622_v37, %v3876_v9  ;;  %v4122_v9 = vadd.f32 %v1632_v19, %v3878_v16  ;;  %v4125_v37 = vadd.f32 %v1634_v43, %v3878_v16  ;;  %v4135_v19 = vadd.f32 %v1644_v23, %v3882_v25 }
 0x302   : > { %v1884_v60 = vadd.f32 1e-05, %v1868_v29  ;;  %v2195_v1 = vadd.f32 1e-05, %v2179_v61  ;;  %v4110_v61 = vadd.f32 %v1626_v50, %v3880_v7  ;;  %v4138_v16 = vadd.f32 %v1646_v4, %v3882_v25 }
 0x303   : > { %v2151_v48 = vpop.xlane.xlu1 %2150  ;;  %v1841_v30 = vpop.xlane.xlu0 %1840  ;;  %v4150_v23 = vadd.f32 %v1652_v54, %v3888_v18 }
 0x304   : > { %2651 = vrsqrt.f32 %v1884_v60  ;;  %v2180_v21 = vmul.f32 0.008474576, %v2151_v48  ;;  %v1869_v52 = vmul.f32 0.008474576, %v1841_v30  ;;  %v4114_v48 = vadd.f32 %v1628_v35, %v3880_v7  ;;  %v1664_v7 = vpop.f32.mrf.mxu1 }
 0x305   : > { %2653 = vrsqrt.f32 %v2195_v1  ;;  %v4129_v35 = vadd.f32 %v1638_v24, %v3884_v36  ;;  %v4143_v24 = vadd.f32 %v1650_v53, %v3888_v18 }
 0x306   : > { %v2646_v55 = vpop.eup %2645  ;;  %v2196_v39 = vadd.f32 1e-05, %v2180_v21  ;;  %v1885_v58 = vadd.f32 1e-05, %v1869_v52  ;;  %v4132_v21 = vadd.f32 %v1640_v11, %v3884_v36 }
 0x307   : > { %v1914_v60 = vmul.f32 %v2646_v55, %v3902_v47  ;;  %v1843_v29 = vpop.xlane.xlu1 %1842  ;;  %v2153_v1 = vpop.xlane.xlu0 %2152 }
 0x308   : > { %2655 = vrsqrt.f32 %v2196_v39  ;;  %v1870_v30 = vmul.f32 0.008474576, %v1843_v29  ;;  %v2181_v33 = vmul.f32 0.008474576, %v2153_v1  ;;  %v4154_v1 = vadd.f32 %v1656_v0, %v3886_v10 }
 0x309   : > { %v1934_v47 = vmul.f32 %v4105_v2, %v1914_v60  ;;  %2657 = vrsqrt.f32 %v1885_v58 }
 0x30a   : > { %v2648_v50 = vpop.eup %2647  ;;  %v1886_v52 = vadd.f32 1e-05, %v1870_v30  ;;  %v2197_v55 = vadd.f32 1e-05, %v2181_v33 }
 0x30b   : > { %v1954_v43 = vadd.f32 %v4119_v31, %v1934_v47  ;;  %v2226_v39 = vmul.f32 %v2648_v50, %v3908_v27  ;;  %v2155_v58 = vpop.xlane.xlu1 %2154  ;;  %v1845_v60 = vpop.xlane.xlu0 %1844  ;;  %v4158_v47 = vadd.f32 %v1658_v22, %v3886_v10  ;;  %v4161_v50 = vadd.f32 %v1662_v26, %v3890_v3  ;;  %v4171_v10 = vld [vmem:[%s4461_s3 + $0x2] ss:$0 sm:$0xff] }
 0x30c   : > { %2659 = vrsqrt.f32 %v1886_v52  ;;  %v2182_v36 = vmul.f32 0.008474576, %v2155_v58  ;;  %v1871_v11 = vmul.f32 0.008474576, %v1845_v60  ;;  %v1668_v27 = vpop.f32.mrf.mxu1 }
 0x30d   : > { %v2650_v29 = vpop.eup %2649  ;;  %v1970_v25 = vadd.f32 %v1954_v43, %v1621_v32  ;;  %v2242_v4 = vmul.f32 %v4105_v2, %v2226_v39  ;;  %2661 = vrsqrt.f32 %v2197_v55  ;;  %v4166_v39 = vadd.f32 %v1664_v7, %v3890_v3 }
 0x30e   : > { %v1915_v53 = vmul.f32 %v2650_v29, %v3915_v15  ;;  %v2198_v30 = vadd.f32 1e-05, %v2182_v36  ;;  %v1887_v33 = vadd.f32 1e-05, %v1871_v11  ;;  %v1670_v60 = vpop.f32.mrf.mxu1  ;;  %v4177_v3 = vadd.f32 %v1668_v27, %v3892_v12 }
 0x30f   : > { %v1986_v18 = vmax.f32 %v1970_v25, 0.0  ;;  %v2258_v54 = vadd.f32 %v4119_v31, %v2242_v4  ;;  %v1847_v32 = vpop.xlane.xlu1 %1846  ;;  %v2157_v52 = vpop.xlane.xlu0 %2156  ;;  %v4180_v7 = vadd.f32 %v1670_v60, %v3892_v12 }
 0x310   : > { %v1935_v55 = vmul.f32 %v4105_v2, %v1915_v53  ;;  %2663 = vrsqrt.f32 %v2198_v30  ;;  %v1872_v0 = vmul.f32 0.008474576, %v1847_v32  ;;  %v2183_v43 = vmul.f32 0.008474576, %v2157_v52 }
 0x311   : > { %v2652_v15 = vpop.eup %2651  ;;  %v2002_v26 = vmul.f32 %v4171_v10, %v1986_v18  ;;  %v2274_v22 = vadd.f32 %v2258_v54, %v1623_v42  ;;  %2665 = vrsqrt.f32 %v1887_v33 }
 0x312   : > { %v2654_v58 = vpop.eup %2653  ;;  %v1955_v36 = vadd.f32 %v4119_v31, %v1935_v55  ;;  %v1916_v11 = vmul.f32 %v2652_v15, %v3925_v46  ;;  %v1888_v29 = vadd.f32 1e-05, %v1872_v0  ;;  %v2199_v25 = vadd.f32 1e-05, %v2183_v43  ;;  %v1674_v55 = vpop.f32.mrf.mxu1 }
 0x313   : > { %2018 = vst [vmem:[%s4183_s10] sm:$0xff] %v2002_v26  ;;  %v2290_v42 = vmax.f32 %v2274_v22, 0.0  ;;  %v2227_v4 = vmul.f32 %v2654_v58, %v3918_v57  ;;  %v2159_v53 = vpop.xlane.xlu1 %2158  ;;  %v1849_v30 = vpop.xlane.xlu0 %1848  ;;  %v4194_v15 = vadd.f32 %v1674_v55, %v3894_v5 }
 0x314   : > { %v1971_v33 = vadd.f32 %v1955_v36, %v4110_v61  ;;  %v1936_v46 = vmul.f32 %v4105_v2, %v1916_v11  ;;  %2667 = vrsqrt.f32 %v1888_v29  ;;  %v2184_v27 = vmul.f32 0.008474576, %v2159_v53 }
 0x315   : > { %v2656_v18 = vpop.eup %2655  ;;  %v2306_v12 = vmul.f32 %v4171_v10, %v2290_v42  ;;  %v2243_v54 = vmul.f32 %v4105_v2, %v2227_v4  ;;  %2669 = vrsqrt.f32 %v2199_v25  ;;  %v1873_v32 = vmul.f32 0.008474576, %v1849_v30 }
 0x316   : > { %v2658_v52 = vpop.eup %2657  ;;  %v1987_v0 = vmax.f32 %v1971_v33, 0.0  ;;  %v1956_v57 = vadd.f32 %v4119_v31, %v1936_v46  ;;  %v2228_v43 = vmul.f32 %v2656_v18, %v3928_v13  ;;  %v2200_v61 = vadd.f32 1e-05, %v2184_v27 }
 0x317   : > { %2322 = vst [vmem:[%s4183_s10 + $0x8] sm:$0xff] %v2306_v12  ;;  %v2259_v26 = vadd.f32 %v4119_v31, %v2243_v54  ;;  %v1917_v22 = vmul.f32 %v2658_v52, %v3936_v14  ;;  %v1889_v58 = vadd.f32 1e-05, %v1873_v32  ;;  %v1851_v60 = vpop.xlane.xlu1 %1850  ;;  %v2161_v36 = vpop.xlane.xlu0 %2160 }
 0x318   : > { %v2003_v11 = vmul.f32 %v4171_v10, %v1987_v0  ;;  %v1972_v29 = vadd.f32 %v1956_v57, %v4122_v9  ;;  %v2244_v25 = vmul.f32 %v4105_v2, %v2228_v43  ;;  %2671 = vrsqrt.f32 %v2200_v61 }
 0x319   : > { %v2660_v13 = vpop.eup %2659  ;;  %v2275_v42 = vadd.f32 %v2259_v26, %v4114_v48  ;;  %v1937_v4 = vmul.f32 %v4105_v2, %v1917_v22  ;;  %2673 = vrsqrt.f32 %v1889_v58  ;;  %v1874_v53 = vmul.f32 0.008474576, %v1851_v60 }
 0x31a   : > { %v2662_v30 = vpop.eup %2661  ;;  %2019 = vst [vmem:[%s4183_s10 + $0x10] sm:$0xff] %v2003_v11  ;;  %v1988_v14 = vmax.f32 %v1972_v29, 0.0  ;;  %v2260_v33 = vadd.f32 %v4119_v31, %v2244_v25  ;;  %v1918_v46 = vmul.f32 %v2660_v13, %v3942_v49  ;;  %v2185_v27 = vmul.f32 0.008474576, %v2161_v36 }
 0x31b   : > { %v2291_v18 = vmax.f32 %v2275_v42, 0.0  ;;  %v1957_v9 = vadd.f32 %v4119_v31, %v1937_v4  ;;  %v2229_v12 = vmul.f32 %v2662_v30, %v3948_v45  ;;  %v1890_v54 = vadd.f32 1e-05, %v1874_v53  ;;  %v2163_v48 = vpop.xlane.xlu1 %2162  ;;  %v1853_v32 = vpop.xlane.xlu0 %1852 }
 0x31c   : > { %v2004_v52 = vmul.f32 %v4171_v10, %v1988_v14  ;;  %v2276_v55 = vadd.f32 %v2260_v33, %v4125_v37  ;;  %v1938_v0 = vmul.f32 %v4105_v2, %v1918_v46  ;;  %v2201_v57 = vadd.f32 1e-05, %v2185_v27 }
 0x31d   : > { %v2664_v43 = vpop.eup %2663  ;;  %v2307_v49 = vmul.f32 %v4171_v10, %v2291_v18  ;;  %v1973_v61 = vadd.f32 %v1957_v9, %v4129_v35  ;;  %v2245_v26 = vmul.f32 %v4105_v2, %v2229_v12  ;;  %2675 = vrsqrt.f32 %v1890_v54 }
 0x31e   : > { %v2666_v45 = vpop.eup %2665  ;;  %2020 = vst [vmem:[%s4183_s10 + $0x20] sm:$0xff] %v2004_v52  ;;  %v2292_v22 = vmax.f32 %v2276_v55, 0.0  ;;  %v1958_v58 = vadd.f32 %v4119_v31, %v1938_v0  ;;  %v2230_v60 = vmul.f32 %v2664_v43, %v3954_v28  ;;  %2677 = vrsqrt.f32 %v2201_v57 }
 0x31f   : > { %2323 = vst [vmem:[%s4183_s10 + $0x18] sm:$0xff] %v2307_v49  ;;  %v1989_v37 = vmax.f32 %v1973_v61, 0.0  ;;  %v2261_v36 = vadd.f32 %v4119_v31, %v2245_v26  ;;  %v1919_v11 = vmul.f32 %v2666_v45, %v3960_v41  ;;  %v2186_v29 = vmul.f32 0.008474576, %v2163_v48  ;;  %v1855_v35 = vpop.xlane.xlu1 %1854  ;;  %v2165_v25 = vpop.xlane.xlu0 %2164 }
 0x320   : > { %v2308_v13 = vmul.f32 %v4171_v10, %v2292_v22  ;;  %v1974_v42 = vadd.f32 %v1958_v58, %v4135_v19  ;;  %v2246_v4 = vmul.f32 %v4105_v2, %v2230_v60  ;;  %v1875_v53 = vmul.f32 0.008474576, %v1853_v32  ;;  %v4239_v26 = vpop.f32.mrf.mxu1 }
 0x321   : > { %v2668_v28 = vpop.eup %2667  ;;  %v2005_v30 = vmul.f32 %v4171_v10, %v1989_v37  ;;  %v2277_v14 = vadd.f32 %v2261_v36, %v4132_v21  ;;  %v1939_v33 = vmul.f32 %v4105_v2, %v1919_v11  ;;  %v2202_v46 = vadd.f32 1e-05, %v2186_v29 }
 0x322   : > { %v2670_v41 = vpop.eup %2669  ;;  %2324 = vst [vmem:[%s4183_s10 + $0x28] sm:$0xff] %v2308_v13  ;;  %v1990_v27 = vmax.f32 %v1974_v42, 0.0  ;;  %v2262_v18 = vadd.f32 %v4119_v31, %v2246_v4  ;;  %v1920_v9 = vmul.f32 %v2668_v28, %v3966_v8  ;;  %v1891_v12 = vadd.f32 1e-05, %v1875_v53 }
 0x323   : > { %2021 = vst [vmem:[%s4183_s10 + $0x30] sm:$0xff] %v2005_v30  ;;  %v2293_v19 = vmax.f32 %v2277_v14, 0.0  ;;  %v1959_v54 = vadd.f32 %v4119_v31, %v1939_v33  ;;  %v2231_v48 = vmul.f32 %v2670_v41, %v3972_v51  ;;  %2679 = vrsqrt.f32 %v2202_v46  ;;  %v2167_v21 = vpop.xlane.xlu1 %2166  ;;  %v1857_v32 = vpop.xlane.xlu0 %1856 }
 0x324   : > { %v2006_v52 = vmul.f32 %v4171_v10, %v1990_v27  ;;  %v2278_v55 = vadd.f32 %v2262_v18, %v4138_v16  ;;  %v1940_v0 = vmul.f32 %v4105_v2, %v1920_v9  ;;  %2681 = vrsqrt.f32 %v1891_v12 }
 0x325   : > { %v2672_v8 = vpop.eup %2671  ;;  %v2309_v57 = vmul.f32 %v4171_v10, %v2293_v19  ;;  %v1975_v43 = vadd.f32 %v1959_v54, %v4143_v24  ;;  %v2247_v49 = vmul.f32 %v4105_v2, %v2231_v48  ;;  %v1876_v61 = vmul.f32 0.008474576, %v1855_v35 }
 0x326   : > { %v2674_v51 = vpop.eup %2673  ;;  %2022 = vst [vmem:[%s4183_s10 + $0x40] sm:$0xff] %v2006_v52  ;;  %v2294_v45 = vmax.f32 %v2278_v55, 0.0  ;;  %v1960_v22 = vadd.f32 %v4119_v31, %v1940_v0  ;;  %v2232_v16 = vmul.f32 %v2672_v8, %v3978_v20  ;;  %v2187_v58 = vmul.f32 0.008474576, %v2165_v25 }
 0x327   : > { %2325 = vst [vmem:[%s4183_s10 + $0x38] sm:$0xff] %v2309_v57  ;;  %v1991_v60 = vmax.f32 %v1975_v43, 0.0  ;;  %v2263_v37 = vadd.f32 %v4119_v31, %v2247_v49  ;;  %v1921_v24 = vmul.f32 %v2674_v51, %v3984_v62  ;;  %v1892_v36 = vadd.f32 1e-05, %v1876_v61  ;;  %v1859_v11 = vpop.xlane.xlu1 %1858  ;;  %v2169_v29 = vpop.xlane.xlu0 %2168 }
 0x328   : > { %v2310_v35 = vmul.f32 %v4171_v10, %v2294_v45  ;;  %v1976_v13 = vadd.f32 %v1960_v22, %v4154_v1  ;;  %v2248_v42 = vmul.f32 %v4105_v2, %v2232_v16  ;;  %v2203_v4 = vadd.f32 1e-05, %v2187_v58  ;;  %v4253_v62 = vpop.f32.mrf.mxu1 }
 0x329   : > { %v2007_v20 = vmul.f32 %v4171_v10, %v1991_v60  ;;  %v2279_v25 = vadd.f32 %v2263_v37, %v4150_v23  ;;  %v1941_v53 = vmul.f32 %v4105_v2, %v1921_v24  ;;  %2683 = vrsqrt.f32 %v1892_v36 }
 0x32a   : > { %v2676_v28 = vpop.eup %2675  ;;  %2326 = vst [vmem:[%s4183_s10 + $0x48] sm:$0xff] %v2310_v35  ;;  %v1992_v30 = vmax.f32 %v1976_v13, 0.0  ;;  %v2264_v14 = vadd.f32 %v4119_v31, %v2248_v42  ;;  %2685 = vrsqrt.f32 %v2203_v4  ;;  %v2188_v33 = vmul.f32 0.008474576, %v2167_v21  ;;  %v4266_v8 = vpop.f32.mrf.mxu1 }
 0x32b   : > { %v2678_v1 = vpop.eup %2677  ;;  %2023 = vst [vmem:[%s4183_s10 + $0x50] sm:$0xff] %v2007_v20  ;;  %v2295_v46 = vmax.f32 %v2279_v25, 0.0  ;;  %v1961_v41 = vadd.f32 %v4119_v31, %v1941_v53  ;;  %v1922_v23 = vmul.f32 %v2676_v28, %v3990_v56  ;;  %v1877_v27 = vmul.f32 0.008474576, %v1857_v32  ;;  %v2171_v18 = vpop.xlane.xlu1 %2170 }
 0x32c   : > { %v1861_v9 = vpop.xlane.xlu0 %1860  ;;  %v2008_v12 = vmul.f32 %v4171_v10, %v1992_v30  ;;  %v2280_v19 = vadd.f32 %v2264_v14, %v4158_v47  ;;  %v2233_v54 = vmul.f32 %v2678_v1, %v3996_v34  ;;  %v2204_v48 = vadd.f32 1e-05, %v2188_v33 }
 0x32d   : > { %v2311_v21 = vmul.f32 %v4171_v10, %v2295_v46  ;;  %v1977_v52 = vadd.f32 %v1961_v41, %v4161_v50  ;;  %v1942_v55 = vmul.f32 %v4105_v2, %v1922_v23  ;;  %v1893_v0 = vadd.f32 1e-05, %v1877_v27 }
 0x32e   : > { %2024 = vst [vmem:[%s4183_s10 + $0x60] sm:$0xff] %v2008_v12  ;;  %v2296_v56 = vmax.f32 %v2280_v19, 0.0  ;;  %v2249_v32 = vmul.f32 %v4105_v2, %v2233_v54  ;;  %2687 = vrsqrt.f32 %v2204_v48  ;;  %v1878_v57 = vmul.f32 0.008474576, %v1859_v11  ;;  %v4277_v11 = vpop.f32.mrf.mxu1 }
 0x32f   : > { %2327 = vst [vmem:[%s4183_s10 + $0x58] sm:$0xff] %v2311_v21  ;;  %v1993_v47 = vmax.f32 %v1977_v52, 0.0  ;;  %v1962_v34 = vadd.f32 %v4119_v31, %v1942_v55  ;;  %2689 = vrsqrt.f32 %v1893_v0  ;;  %v2189_v43 = vmul.f32 0.008474576, %v2169_v29  ;;  %v1863_v49 = vpop.xlane.xlu1 %1862 }
 0x330   : > { %v2173_v50 = vpop.xlane.xlu0 %2172  ;;  %v2680_v61 = vpop.eup %2679  ;;  %v2312_v51 = vmul.f32 %v4171_v10, %v2296_v56  ;;  %v2265_v45 = vadd.f32 %v4119_v31, %v2249_v32  ;;  %v1894_v22 = vadd.f32 1e-05, %v1878_v57  ;;  %v2190_v16 = vmul.f32 0.008474576, %v2171_v18 }
 0x331   : > { %v2682_v58 = vpop.eup %2681  ;;  %v2009_v60 = vmul.f32 %v4171_v10, %v1993_v47  ;;  %v1978_v37 = vadd.f32 %v1962_v34, %v4177_v3  ;;  %v2234_v24 = vmul.f32 %v2680_v61, %v4002_v40  ;;  %v2205_v36 = vadd.f32 1e-05, %v2189_v43  ;;  %v1688_v1 = vpop.f32.mrf.mxu1 }
 0x332   : > { %2328 = vst [vmem:[%s4183_s10 + $0x68] sm:$0xff] %v2312_v51  ;;  %v2281_v29 = vadd.f32 %v2265_v45, %v4166_v39  ;;  %v1923_v35 = vmul.f32 %v2682_v58, %v4008_v63  ;;  %2691 = vrsqrt.f32 %v1894_v22  ;;  %v2206_v13 = vadd.f32 1e-05, %v2190_v16 }
 0x333   : > { %2025 = vst [vmem:[%s4183_s10 + $0x70] sm:$0xff] %v2009_v60  ;;  %v1994_v42 = vmax.f32 %v1978_v37, 0.0  ;;  %v2250_v4 = vmul.f32 %v4105_v2, %v2234_v24  ;;  %2693 = vrsqrt.f32 %v2205_v36  ;;  %v1879_v20 = vmul.f32 0.008474576, %v1861_v9  ;;  %v2175_v25 = vpop.xlane.xlu1 %2174  ;;  %v1692_v54 = vpop.f32.mrf.mxu1  ;;  %v4493_v24 = vld [vmem:[#allocation4_spill] sm:$0xff] }
 0x334   : > { %v1865_v3 = vpop.xlane.xlu0 %1864  ;;  %v2297_v40 = vmax.f32 %v2281_v29, 0.0  ;;  %v1943_v53 = vmul.f32 %v4105_v2, %v1923_v35  ;;  %2695 = vrsqrt.f32 %v2206_v13  ;;  %v1880_v28 = vmul.f32 0.008474576, %v1863_v49 }
 0x335   : > { %v2010_v39 = vmul.f32 %v4171_v10, %v1994_v42  ;;  %v2266_v63 = vadd.f32 %v4119_v31, %v2250_v4  ;;  %v1895_v30 = vadd.f32 1e-05, %v1879_v20  ;;  %v2191_v14 = vmul.f32 0.008474576, %v2173_v50  ;;  %v1694_v50 = vpop.f32.mrf.mxu1  ;;  %v4494_v4 = vld [vmem:[#allocation5_spill] sm:$0xff] }
 0x336   : > { %v2684_v33 = vpop.eup %2683  ;;  %v2313_v46 = vmul.f32 %v4171_v10, %v2297_v40  ;;  %v1963_v41 = vadd.f32 %v4119_v31, %v1943_v53  ;;  %v1896_v23 = vadd.f32 1e-05, %v1880_v28  ;;  %v2192_v27 = vmul.f32 0.008474576, %v2175_v25 }
 0x337   : > { %v2686_v18 = vpop.eup %2685  ;;  %2026 = vst [vmem:[%s4183_s10 + $0x80] sm:$0xff] %v2010_v39  ;;  %v2282_v9 = vadd.f32 %v2266_v63, %v4180_v7  ;;  %v1924_v12 = vmul.f32 %v2684_v33, %v4014_v44  ;;  %2697 = vrsqrt.f32 %v1895_v30  ;;  %v2207_v19 = vadd.f32 1e-05, %v2191_v14  ;;  %v4496_v30 = vld [vmem:[#allocation7_spill] sm:$0xff]  ;;  %v4497_v33 = vld [vmem:[#allocation14_spill] sm:$0xff] }
 0x338   : > { %2329 = vst [vmem:[%s4183_s10 + $0x78] sm:$0xff] %v2313_v46  ;;  %v1979_v48 = vadd.f32 %v1963_v41, %v4194_v15  ;;  %v2235_v21 = vmul.f32 %v2686_v18, %v4020_v17  ;;  %2699 = vrsqrt.f32 %v1896_v23  ;;  %v2208_v52 = vadd.f32 1e-05, %v2192_v27  ;;  %v2177_v32 = vpop.xlane.xlu0 %2176  ;;  %v4498_v18 = vld [vmem:[#allocation15_spill] sm:$0xff] }
 0x339   : > { %v2298_v55 = vmax.f32 %v2282_v9, 0.0  ;;  %v1944_v0 = vmul.f32 %v4105_v2, %v1924_v12  ;;  %2701 = vrsqrt.f32 %v2207_v19  ;;  %v1881_v56 = vmul.f32 0.008474576, %v1865_v3 }
 0x33a   : > { %v1677_v44 = vadd.f32 %v4239_v26, %v3894_v5  ;;  %v1995_v7 = vmax.f32 %v1979_v48, 0.0  ;;  %v2251_v57 = vmul.f32 %v4105_v2, %v2235_v21  ;;  %2703 = vrsqrt.f32 %v2208_v52 }
 0x33b   : > { %v2688_v47 = vpop.eup %2687  ;;  %v1681_v17 = vadd.f32 %v4253_v62, %v3898_v6  ;;  %v2314_v15 = vmul.f32 %v4171_v10, %v2298_v55  ;;  %v1964_v34 = vadd.f32 %v4119_v31, %v1944_v0  ;;  %v1897_v43 = vadd.f32 1e-05, %v1881_v56  ;;  %v1698_v62 = vpop.f32.mrf.mxu1  ;;  %v4499_v0 = vld [vmem:[#allocation8_spill] sm:$0xff] }
 0x33c   : > { %v2690_v49 = vpop.eup %2689  ;;  %v2011_v61 = vmul.f32 %v4171_v10, %v1995_v7  ;;  %v2267_v5 = vadd.f32 %v4119_v31, %v2251_v57  ;;  %v2236_v26 = vmul.f32 %v2688_v47, %v4024_v59  ;;  %v2193_v51 = vmul.f32 0.008474576, %v2177_v32 }
 0x33d   : > { %2330 = vst [vmem:[%s4183_s10 + $0x88] sm:$0xff] %v2314_v15  ;;  %v1980_v45 = vadd.f32 %v1964_v34, %v1681_v17  ;;  %v1925_v22 = vmul.f32 %v2690_v49, %v4032_v38  ;;  %2705 = vrsqrt.f32 %v1897_v43  ;;  %v1687_v36 = vadd.f32 %v4277_v11, %v4493_v24  ;;  %v1700_v53 = vpop.f32.mrf.mxu1  ;;  %v4500_v17 = vld [vmem:[#allocation9_spill] sm:$0xff]  ;;  %v1499_v34 = vpop.permute.xlu1 %1498 }
 0x33e   : > { %2027 = vst [vmem:[%s4183_s10 + $0x90] sm:$0xff] %v2011_v61  ;;  %v2283_v16 = vadd.f32 %v2267_v5, %v1677_v44  ;;  %v2252_v58 = vmul.f32 %v4105_v2, %v2236_v26  ;;  %v2209_v60 = vadd.f32 1e-05, %v2193_v51  ;;  %v1683_v29 = vadd.f32 %v4266_v8, %v3898_v6  ;;  %v4495_v6 = vld [vmem:[#allocation6_spill] sm:$0xff] }
 0x33f   : > { %v2692_v37 = vpop.eup %2691  ;;  %v1996_v59 = vmax.f32 %v1980_v45, 0.0  ;;  %v1945_v35 = vmul.f32 %v4105_v2, %v1925_v22  ;;  %v1689_v3 = vadd.f32 %v1688_v1, %v4493_v24  ;;  %v1693_v46 = vadd.f32 %v1692_v54, %v4497_v33  ;;  %v1704_v32 = vpop.f32.mrf.mxu1  ;;  %v4501_v5 = vld [vmem:[#allocation10_spill] sm:$0xff] }
 0x340   : > { %v2694_v13 = vpop.eup %2693  ;;  %v2299_v42 = vmax.f32 %v2283_v16, 0.0  ;;  %v2268_v38 = vadd.f32 %v4119_v31, %v2252_v58  ;;  %v1926_v20 = vmul.f32 %v2692_v37, %v4494_v4  ;;  %2707 = vrsqrt.f32 %v2209_v60 }
 0x341   : > { %v2696_v25 = vpop.eup %2695  ;;  %v2012_v11 = vmul.f32 %v4171_v10, %v1996_v59  ;;  %v1965_v40 = vadd.f32 %v4119_v31, %v1945_v35  ;;  %v2237_v8 = vmul.f32 %v2694_v13, %v4495_v6  ;;  %v1695_v41 = vadd.f32 %v1694_v50, %v4497_v33  ;;  %v1706_v24 = vpop.f32.mrf.mxu1 }
 0x342   : > { %v2315_v28 = vmul.f32 %v4171_v10, %v2299_v42  ;;  %v2284_v39 = vadd.f32 %v2268_v38, %v1683_v29  ;;  %v1946_v63 = vmul.f32 %v4105_v2, %v1926_v20  ;;  %v2238_v14 = vmul.f32 %v2696_v25, %v4496_v30 }
 0x343   : > { %2028 = vst [vmem:[%s4183_s10 + $0xa0] sm:$0xff] %v2012_v11  ;;  %v1981_v1 = vadd.f32 %v1965_v40, %v1687_v36  ;;  %v2253_v23 = vmul.f32 %v4105_v2, %v2237_v8  ;;  %v1699_v9 = vadd.f32 %v1698_v62, %v4498_v18  ;;  %v1701_v52 = vadd.f32 %v1700_v53, %v4498_v18  ;;  %v4502_v62 = vld [vmem:[#allocation11_spill] sm:$0xff]  ;;  %v1710_v25 = vpop.f32.mrf.mxu1 }
 0x344   : > { %v2698_v27 = vpop.eup %2697  ;;  %2331 = vst [vmem:[%s4183_s10 + $0x98] sm:$0xff] %v2315_v28  ;;  %v2300_v12 = vmax.f32 %v2284_v39, 0.0  ;;  %v1966_v19 = vadd.f32 %v4119_v31, %v1946_v63  ;;  %v2254_v48 = vmul.f32 %v4105_v2, %v2238_v14  ;;  %v1705_v36 = vadd.f32 %v1704_v32, %v1499_v34  ;;  %v1504_v28 = vpop.permute.xlu0 %1503 }
 0x345   : > { %v2700_v21 = vpop.eup %2699  ;;  %v1997_v54 = vmax.f32 %v1981_v1, 0.0  ;;  %v2269_v55 = vadd.f32 %v4119_v31, %v2253_v23  ;;  %v1927_v56 = vmul.f32 %v2698_v27, %v4499_v0  ;;  %v1707_v8 = vadd.f32 %v1706_v24, %v1499_v34  ;;  %v1712_v18 = vpop.f32.mrf.mxu1  ;;  %v2370_v34 = vld [vmem:[%s4183_s10 + $0x28] sm:$0xff] (%p2798_p5) }
 0x346   : > { %v2702_v44 = vpop.eup %2701  ;;  %v2316_v7 = vmul.f32 %v4171_v10, %v2300_v12  ;;  %v1982_v57 = vadd.f32 %v1966_v19, %v1693_v46  ;;  %v2270_v47 = vadd.f32 %v4119_v31, %v2254_v48  ;;  %v1928_v15 = vmul.f32 %v2700_v21, %v4500_v17  ;;  %v2364_v17 = vld [vmem:[%s4183_s10 + $0x10] sm:$0xff] (%p2798_p5)  ;;  %2371 = vst [vmem:[%s4385_s26 + $0x88] sm:$0xff] (%p2798_p5), %v2370_v34 }
 0x347   : > { %v2704_v43 = vpop.eup %2703  ;;  %v2013_v49 = vmul.f32 %v4171_v10, %v1997_v54  ;;  %v2285_v50 = vadd.f32 %v2269_v55, %v1689_v3  ;;  %v1947_v61 = vmul.f32 %v4105_v2, %v1927_v56  ;;  %v2239_v26 = vmul.f32 %v2702_v44, %v4501_v5  ;;  %v4503_v3 = vld [vmem:[#allocation12_spill] sm:$0xff]  ;;  %2365 = vst [vmem:[%s4385_s26 + $0x40] sm:$0xff] (%p2798_p5), %v2364_v17  ;;  %v2380_v5 = vld [vmem:[%s4183_s10 + $0x50] sm:$0xff] (%p2798_p5) }
 0x348   : > { %2332 = vst [vmem:[%s4183_s10 + $0xa8] sm:$0xff] %v2316_v7  ;;  %v1998_v51 = vmax.f32 %v1982_v57, 0.0  ;;  %v2286_v45 = vadd.f32 %v2270_v47, %v1695_v41  ;;  %v1948_v22 = vmul.f32 %v4105_v2, %v1928_v15  ;;  %v2240_v16 = vmul.f32 %v2704_v43, %v4502_v62  ;;  %v4504_v41 = vld [vmem:[#allocation13_spill] sm:$0xff]  ;;  %v2368_v15 = vld [vmem:[%s4183_s10 + $0x20] sm:$0xff] (%p2798_p5)  ;;  %v2372_v43 = vld [vmem:[%s4183_s10 + $0x30] sm:$0xff] (%p2798_p5) }
 0x349   : > { %2029 = vst [vmem:[%s4183_s10 + $0xb0] sm:$0xff] %v2013_v49  ;;  %v2301_v58 = vmax.f32 %v2285_v50, 0.0  ;;  %v1967_v60 = vadd.f32 %v4119_v31, %v1947_v61  ;;  %v2255_v37 = vmul.f32 %v4105_v2, %v2239_v26  ;;  %v1711_v12 = vadd.f32 %v1710_v25, %v1504_v28  ;;  %v2362_v47 = vld [vmem:[%s4183_s10 + $0x8] sm:$0xff] (%p2798_p5)  ;;  %2369 = vst [vmem:[%s4385_s26 + $0x80] sm:$0xff] (%p2798_p5), %v2368_v15  ;;  %v2374_v49 = vld [vmem:[%s4183_s10 + $0x38] sm:$0xff] (%p2798_p5) }
 0x34a   : > { %v2706_v29 = vpop.eup %2705  ;;  %v2014_v59 = vmul.f32 %v4171_v10, %v1998_v51  ;;  %v2302_v35 = vmax.f32 %v2286_v45, 0.0  ;;  %v1968_v13 = vadd.f32 %v4119_v31, %v1948_v22  ;;  %v2256_v42 = vmul.f32 %v4105_v2, %v2240_v16  ;;  %2363 = vst [vmem:[%s4385_s26 + $0x8] sm:$0xff] (%p2798_p5), %v2362_v47  ;;  %v2376_v50 = vld [vmem:[%s4183_s10 + $0x40] sm:$0xff] (%p2798_p5)  ;;  %2373 = vst [vmem:[%s4385_s26 + $0xc0] sm:$0xff] (%p2798_p5), %v2372_v43  ;;  %v2378_v61 = vld [vmem:[%s4183_s10 + $0x48] sm:$0xff] (%p2798_p5) }
 0x34b   : > { %v2317_v38 = vmul.f32 %v4171_v10, %v2301_v58  ;;  %v1983_v4 = vadd.f32 %v1967_v60, %v1699_v9  ;;  %v2271_v20 = vadd.f32 %v4119_v31, %v2255_v37  ;;  %v1929_v11 = vmul.f32 %v2706_v29, %v4503_v3  ;;  %2375 = vst [vmem:[%s4385_s26 + $0xc8] sm:$0xff] (%p2798_p5), %v2374_v49  ;;  %v2382_v26 = vld [vmem:[%s4183_s10 + $0x58] sm:$0xff] (%p2798_p5)  ;;  %v2384_v51 = vld [vmem:[%s4183_s10 + $0x60] sm:$0xff] (%p2798_p5)  ;;  %v2386_v45 = vld [vmem:[%s4183_s10 + $0x68] sm:$0xff] (%p2798_p5) }
 0x34c   : > { %2030 = vst [vmem:[%s4183_s10 + $0xc0] sm:$0xff] %v2014_v59  ;;  %v2318_v40 = vmul.f32 %v4171_v10, %v2302_v35  ;;  %v2272_v6 = vadd.f32 %v4119_v31, %v2256_v42  ;;  %v1984_v53 = vadd.f32 %v1968_v13, %v1705_v36  ;;  %v1713_v56 = vadd.f32 %v1712_v18, %v1504_v28  ;;  %v2388_v22 = vld [vmem:[%s4183_s10 + $0x70] sm:$0xff] (%p2798_p5)  ;;  %v2390_v62 = vld [vmem:[%s4183_s10 + $0x78] sm:$0xff] (%p2798_p5)  ;;  %v2392_v16 = vld [vmem:[%s4183_s10 + $0x80] sm:$0xff] (%p2798_p5) }
 0x34d   : > { %v2708_v39 = vpop.eup %2707  ;;  %2333 = vst [vmem:[%s4183_s10 + $0xb8] sm:$0xff] %v2317_v38  ;;  %v1999_v63 = vmax.f32 %v1983_v4, 0.0  ;;  %v2287_v30 = vadd.f32 %v2271_v20, %v1701_v52  ;;  %v1949_v14 = vmul.f32 %v4105_v2, %v1929_v11  ;;  %2377 = vst [vmem:[%s4385_s26 + $0x100] sm:$0xff] (%p2798_p5), %v2376_v50  ;;  %v2394_v58 = vld [vmem:[%s4183_s10 + $0x88] sm:$0xff] (%p2798_p5)  ;;  %v2396_v60 = vld [vmem:[%s4183_s10 + $0x90] sm:$0xff] (%p2798_p5) }
 0x34e   : > { %2334 = vst [vmem:[%s4183_s10 + $0xc8] sm:$0xff] %v2318_v40  ;;  %v2000_v33 = vmax.f32 %v1984_v53, 0.0  ;;  %v2288_v46 = vadd.f32 %v2272_v6, %v1707_v8  ;;  %v2241_v1 = vmul.f32 %v2708_v39, %v4504_v41  ;;  %2379 = vst [vmem:[%s4385_s26 + $0x108] sm:$0xff] (%p2798_p5), %v2378_v61  ;;  %v2398_v37 = vld [vmem:[%s4183_s10 + $0x98] sm:$0xff] (%p2798_p5)  ;;  %v2400_v24 = vld [vmem:[%s4183_s10 + $0xa0] sm:$0xff] (%p2798_p5) }
 0x34f   : > { %v2015_v23 = vmul.f32 %v4171_v10, %v1999_v63  ;;  %v2303_v27 = vmax.f32 %v2287_v30, 0.0  ;;  %v1969_v9 = vadd.f32 %v4119_v31, %v1949_v14  ;;  %2381 = vst [vmem:[%s4385_s26 + $0x140] sm:$0xff] (%p2798_p5), %v2380_v5  ;;  %2383 = vst [vmem:[%s4385_s26 + $0x148] sm:$0xff] (%p2798_p5), %v2382_v26  ;;  %v2402_v36 = vld [vmem:[%s4183_s10 + $0xa8] sm:$0xff] (%p2798_p5) }
 0x350   : > { %v2016_v19 = vmul.f32 %v4171_v10, %v2000_v33  ;;  %v2304_v48 = vmax.f32 %v2288_v46, 0.0  ;;  %v2257_v21 = vmul.f32 %v4105_v2, %v2241_v1  ;;  %2385 = vst [vmem:[%s4385_s26 + $0x180] sm:$0xff] (%p2798_p5), %v2384_v51  ;;  %2387 = vst [vmem:[%s4385_s26 + $0x188] sm:$0xff] (%p2798_p5), %v2386_v45  ;;  %v2404_v29 = vld [vmem:[%s4183_s10 + $0xb0] sm:$0xff] (%p2798_p5) }
 0x351   : > { %2031 = vst [vmem:[%s4183_s10 + $0xd0] sm:$0xff] %v2015_v23  ;;  %v2319_v52 = vmul.f32 %v4171_v10, %v2303_v27  ;;  %v1985_v54 = vadd.f32 %v1969_v9, %v1711_v12  ;;  %2389 = vst [vmem:[%s4385_s26 + $0x1c0] sm:$0xff] (%p2798_p5), %v2388_v22 }
 0x352   : > { %2032 = vst [vmem:[%s4183_s10 + $0xe0] sm:$0xff] %v2016_v19  ;;  %v2320_v55 = vmul.f32 %v4171_v10, %v2304_v48  ;;  %v2273_v0 = vadd.f32 %v4119_v31, %v2257_v21  ;;  %v2360_v31 = vld [vmem:[%s4183_s10] sm:$0xff] (%p2798_p5)  ;;  %2391 = vst [vmem:[%s4385_s26 + $0x1c8] sm:$0xff] (%p2798_p5), %v2390_v62 }
 0x353   : > { %2335 = vst [vmem:[%s4183_s10 + $0xd8] sm:$0xff] %v2319_v52  ;;  %v2001_v32 = vmax.f32 %v1985_v54, 0.0  ;;  %2361 = vst [vmem:[%s4385_s26] sm:$0xff] (%p2798_p5), %v2360_v31  ;;  %v2408_v35 = vld [vmem:[%s4183_s10 + $0xc0] sm:$0xff] (%p2798_p5) }
 0x354   : > { %2336 = vst [vmem:[%s4183_s10 + $0xe8] sm:$0xff] %v2320_v55  ;;  %v2289_v44 = vadd.f32 %v2273_v0, %v1713_v56  ;;  %2393 = vst [vmem:[%s4385_s26 + $0x200] sm:$0xff] (%p2798_p5), %v2392_v16  ;;  %v2406_v59 = vld [vmem:[%s4183_s10 + $0xb8] sm:$0xff] (%p2798_p5) }
 0x355   : > { %v2017_v7 = vmul.f32 %v4171_v10, %v2001_v32  ;;  %2395 = vst [vmem:[%s4385_s26 + $0x208] sm:$0xff] (%p2798_p5), %v2394_v58  ;;  %2397 = vst [vmem:[%s4385_s26 + $0x240] sm:$0xff] (%p2798_p5), %v2396_v60  ;;  %v2410_v13 = vld [vmem:[%s4183_s10 + $0xc8] sm:$0xff] (%p2798_p5) }
 0x356   : > { %v2305_v57 = vmax.f32 %v2289_v44, 0.0  ;;  %2344 = sbr.rel (!%p2798_p5) target bundleno = 867 (0x363), region = 67  ;;  %2399 = vst [vmem:[%s4385_s26 + $0x248] sm:$0xff] (%p2798_p5), %v2398_v37  ;;  %2401 = vst [vmem:[%s4385_s26 + $0x280] sm:$0xff] (%p2798_p5), %v2400_v24 }
 0x357   : > { %2033 = vst [vmem:[%s4183_s10 + $0xf0] sm:$0xff] %v2017_v7  ;;  %2403 = vst [vmem:[%s4385_s26 + $0x288] sm:$0xff] (%p2798_p5), %v2402_v36 }
 0x358   : > { %v2321_v2 = vmul.f32 %v4171_v10, %v2305_v57  ;;  %v2366_v10 = vld [vmem:[%s4183_s10 + $0x18] sm:$0xff] (%p2798_p5)  ;;  %2405 = vst [vmem:[%s4385_s26 + $0x2c0] sm:$0xff] (%p2798_p5), %v2404_v29  ;;  %2407 = vst [vmem:[%s4385_s26 + $0x2c8] sm:$0xff] (%p2798_p5), %v2406_v59  ;;  %v2412_v42 = vld [vmem:[%s4183_s10 + $0xd0] sm:$0xff] (%p2798_p5) }
 0x359   : > { %2367 = vst [vmem:[%s4385_s26 + $0x48] sm:$0xff] (%p2798_p5), %v2366_v10  ;;  %2409 = vst [vmem:[%s4385_s26 + $0x300] sm:$0xff] (%p2798_p5), %v2408_v35  ;;  %v2416_v4 = vld [vmem:[%s4183_s10 + $0xe0] sm:$0xff] (%p2798_p5) }
 0x35a   : > { %2337 = vst [vmem:[%s4183_s10 + $0xf8] sm:$0xff] %v2321_v2  ;;  %2411 = vst [vmem:[%s4385_s26 + $0x308] sm:$0xff] (%p2798_p5), %v2410_v13  ;;  %v2414_v38 = vld [vmem:[%s4183_s10 + $0xd8] sm:$0xff] (%p2798_p5) }
 0x35b   : > { %2413 = vst [vmem:[%s4385_s26 + $0x340] sm:$0xff] %v2412_v42  ;;  %v2418_v20 = vld [vmem:[%s4183_s10 + $0xe8] sm:$0xff]  ;;  %2415 = vst [vmem:[%s4385_s26 + $0x348] sm:$0xff] %v2414_v38 }
 0x35c   : > { %2417 = vst [vmem:[%s4385_s26 + $0x380] sm:$0xff] %v2416_v4  ;;  %2419 = vst [vmem:[%s4385_s26 + $0x388] sm:$0xff] %v2418_v20 }
 0x35e   : > { %v2420_v25 = vld [vmem:[%s4183_s10 + $0xf0] sm:$0xff] }
 0x35f   : > { %2421 = vst [vmem:[%s4385_s26 + $0x3c0] sm:$0xff] %v2420_v25 }
 0x361   : > { %v2422_v3 = vld [vmem:[%s4183_s10 + $0xf8] sm:$0xff] }
 0x362   : > { %2423 = vst [vmem:[%s4385_s26 + $0x3c8] sm:$0xff] %v2422_v3 }
 0x363 PF: > { %p12_p10 = scmp.ge.s32.totalorder %s2785_s22, 6   ;;  %s4505_s18 = smov %s2728_s19 }
 0x364   : > { %s4506_s19 = smov %s2796_s25  ;;  %s4507_s20 = smov %s2785_s22 }
 0x365   :  { %14 = sbr.rel (!%p12_p10) target bundleno = 2 (0x2), region = 124 }

</bundles_post_ra>
